<compile_context>
chip_gen: v7x
topology: tpu7x:2x2x1
jax: 0.10.0
libtpu: 0.0.40
codegen_flags: <defaults>
</compile_context>

<pallas_src>
import jax
import jax.numpy as jnp
from jax.experimental import pallas as pl
from jax.experimental.pallas import tpu as pltpu

NUM_RELATIONS = 3   # RGCNConv(5, H, 3)
TAG_K = 3           # TAGConv(..., K=3)
_PAD = -1           # sentinel index for padded edges (matches no node id)


# ----------------------------------------------------------------------------
# Kernel factory (all shape constants / slab offsets are static Python ints)
# ----------------------------------------------------------------------------
def _make_kernel(n_v, n_s, max_e, offs, rows, wcols):
    def kernel(game_x_ref, state_x_ref, dst_ref, src_ref, attr_ref, w_ref, o_ref):
        f32 = jnp.float32

        def mm(a, b):
            return jnp.dot(a, b, preferred_element_type=f32)

        def w_blk(i):                                   # static slab slice
            return w_ref[offs[i]:offs[i] + rows[i], 0:wcols[i]]

        def bias(i):                                    # single aligned bias tile
            return w_ref[offs[8] + i:offs[8] + i + 1, 0:wcols[i]]

        def dst_oh(row, n):                             # (n, maxE) dst one-hot
            iota = jax.lax.broadcasted_iota(jnp.int32, (n, max_e), 0)
            return jnp.where(iota == dst_ref[row:row + 1, :], 1.0, 0.0).astype(f32)

        def src_oh(col, n):                             # (maxE, n) src one-hot
            iota = jax.lax.broadcasted_iota(jnp.int32, (max_e, n), 1)
            return jnp.where(iota == src_ref[:, col:col + 1], 1.0, 0.0).astype(f32)

        def row_mean(a):                                # mean aggregation rows
            return a / jnp.maximum(jnp.sum(a, axis=1, keepdims=True), 1.0)

        def dinv_sqrt(a):                               # gcn_norm scaling vector
            deg = jnp.sum(a, axis=1, keepdims=True)
            return jnp.where(deg > 0.0, jax.lax.rsqrt(jnp.maximum(deg, 1.0)), 0.0)

        x = game_x_ref[...]                             # (n_v, game_in)
        sx = state_x_ref[...]                           # (n_s, state_in)
        attr = attr_ref[...]                            # (1, maxE) f32
        et = dst_ref[1:2, :]                            # (1, maxE) relation ids

        # ------------------ adjacency builds (4 MXU contractions) -----------
        d_vv = dst_oh(0, n_v)
        d_stack = jnp.concatenate(
            [d_vv * jnp.where(et == r, 1.0, 0.0) for r in range(NUM_RELATIONS)]
            + [d_vv], axis=0)                                    # (4n_v, maxE)
        adj_vv = mm(d_stack, src_oh(0, n_v))                     # (4n_v, n_v)
        a_rel_mean = row_mean(adj_vv[:NUM_RELATIONS * n_v, :])   # stacked per-rel mean
        a_vv = adj_vv[NUM_RELATIONS * n_v:, :]                   # raw counts (TAG)
        dinv_v = dinv_sqrt(a_vv)

        d_h = dst_oh(2, n_s)
        adj_h = mm(jnp.concatenate([d_h * attr, d_h], axis=0),
                   src_oh(1, n_v))                               # (2n_s, n_v)
        a_hist_w = adj_h[:n_s, :]                                # weighted add
        a_hist_mean = row_mean(adj_h[n_s:, :])                   # SAGE mean

        a_in_mean = row_mean(mm(dst_oh(3, n_s), src_oh(2, n_v)))  # (n_s, n_v)

        a_ss = mm(dst_oh(4, n_s), src_oh(3, n_s))                # (n_s, n_s) counts
        a_ss_mean = row_mean(a_ss)
        dinv_s = dinv_sqrt(a_ss)

        # -------- game tower: conv1 (RGCN, mean) + conv12 (TAG K=3), 'sum' --
        rel_agg = mm(a_rel_mean, x)                              # (3n_v, game_in)
        hops = []
        h = x
        for _ in range(TAG_K):                                   # true sequential dep
            h = dinv_v * mm(a_vv, dinv_v * h)                    # folded gcn_norm
            hops.append(h)
        feats = jnp.concatenate(
            [x] + [rel_agg[r * n_v:(r + 1) * n_v, :] for r in range(NUM_RELATIONS)]
            + hops, axis=1)                                      # (n_v, 7*game_in)
        game_h = mm(feats, w_blk(0)) + bias(0)                   # (n_v, H)

        # ------------------------------ state tower -------------------------
        aggs = mm(jnp.concatenate([a_hist_w, a_hist_mean, a_in_mean], axis=0),
                  game_h)                                        # (3n_s, H)

        def fused(agg, xd, i):
            # [agg | x_dst] @ [W_nbr ; W_root] + b_nbr, relu -- one MXU dot.
            z = mm(jnp.concatenate([agg, xd], axis=1), w_blk(i)) + bias(i)
            return jnp.maximum(z, 0.0)

        s = fused(aggs[:n_s, :], sx, 1)                          # conv3  GraphConv
        s = fused(aggs[n_s:2 * n_s, :], s, 2)                    # conv32 SAGE
        s = fused(aggs[2 * n_s:, :], s, 3)                       # conv4  SAGE
        s = fused(aggs[2 * n_s:, :], s, 4)                       # conv42 SAGE (shares agg)

        hops2 = [s]
        h = s
        for _ in range(TAG_K):                                   # conv2 TAG(K=3)
            h = dinv_s * mm(a_ss, dinv_s * h)
            hops2.append(h)
        s = jnp.maximum(mm(jnp.concatenate(hops2, axis=1), w_blk(5)) + bias(5), 0.0)

        s = fused(mm(a_ss_mean, s), s, 6)                        # conv5  SAGE

        o_ref[...] = mm(s, w_blk(7)) + bias(7)                   # lin
    return kernel


# ----------------------------------------------------------------------------
# Host-side packing
# ----------------------------------------------------------------------------
def _pack_edges(edge_index_v_v, edge_type_v_v, edge_index_history_v_s,
                edge_attr_history_v_s, edge_index_in_v_s, edge_index_s_s):
    max_e = max(int(edge_index_v_v.shape[1]),
                int(edge_index_history_v_s.shape[1]),
                int(edge_index_in_v_s.shape[1]),
                int(edge_index_s_s.shape[1]))

    def pad(v):
        v = v.astype(jnp.int32)
        return jnp.pad(v, (0, max_e - v.shape[0]), constant_values=_PAD)

    dst_rows = jnp.stack([
        pad(edge_index_v_v[1]),            # row 0: v->v dst
        pad(edge_type_v_v),                # row 1: v->v relation id
        pad(edge_index_history_v_s[1]),    # row 2: history dst (state)
        pad(edge_index_in_v_s[1]),         # row 3: in-edge dst (state)
        pad(edge_index_s_s[1]),            # row 4: s->s dst
    ])                                                       # (5, maxE) int32
    src_cols = jnp.stack([
        pad(edge_index_v_v[0]),
        pad(edge_index_history_v_s[0]),
        pad(edge_index_in_v_s[0]),
        pad(edge_index_s_s[0]),
    ], axis=1)                                               # (maxE, 4) int32
    attr = jnp.pad(edge_attr_history_v_s.astype(jnp.float32),
                   (0, max_e - edge_attr_history_v_s.shape[0])).reshape(1, max_e)
    return dst_rows, src_cols, attr, max_e


def _pack_weight_slab(p, hidden, out_ch):
    """One contiguous f32 slab; 8-row-aligned block starts; all biases in one tile."""
    ncols = max(hidden, out_ch)

    def pad_c(w):
        return jnp.pad(w, ((0, 0), (0, ncols - w.shape[1])))

    def pad_r8(w):
        return jnp.pad(w, ((0, (-w.shape[0]) % 8), (0, 0)))

    w_game = jnp.concatenate(
        [p["w_rgcn_root"] + p["w_tag1"][0],                  # merged root + hop-0
         p["w_rgcn_rel"].reshape(-1, hidden),
         p["w_tag1"][1:].reshape(-1, hidden)], axis=0)       # (7*game_in, H)
    biases = jnp.concatenate(
        [p["b_rgcn"] + p["b_tag1"], p["b3_rel"], p["b32_l"], p["b4_l"],
         p["b42_l"], p["b_tag2"], p["b5_l"], pad_c(p["b_lin"])[:, :hidden]
         if out_ch <= hidden else p["b_lin"]], axis=0) \
        if False else jnp.concatenate(
        [pad_c(p["b_rgcn"] + p["b_tag1"]), pad_c(p["b3_rel"]), pad_c(p["b32_l"]),
         pad_c(p["b4_l"]), pad_c(p["b42_l"]), pad_c(p["b_tag2"]), pad_c(p["b5_l"]),
         pad_c(p["b_lin"])], axis=0)                         # (8, ncols)

    blocks = [
        pad_c(w_game),                                                   # 0 conv1+conv12
        pad_c(jnp.concatenate([p["w3_rel"], p["w3_root"]], axis=0)),     # 1 conv3
        pad_c(jnp.concatenate([p["w32_l"], p["w32_r"]], axis=0)),        # 2 conv32
        pad_c(jnp.concatenate([p["w4_l"], p["w4_r"]], axis=0)),          # 3 conv4
        pad_c(jnp.concatenate([p["w42_l"], p["w42_r"]], axis=0)),        # 4 conv42
        pad_c(p["w_tag2"].reshape(-1, hidden)),                          # 5 conv2
        pad_c(jnp.concatenate([p["w5_l"], p["w5_r"]], axis=0)),          # 6 conv5
        pad_c(p["w_lin"]),                                               # 7 lin
        biases,                                                          # 8 all biases
    ]
    offs, rows, padded, off = [], [], [], 0
    for b in blocks:
        offs.append(off)
        rows.append(b.shape[0])
        bp = pad_r8(b)
        padded.append(bp)
        off += bp.shape[0]
    wcols = (hidden,) * 7 + (out_ch,)
    return jnp.concatenate(padded, axis=0), tuple(offs), tuple(rows), wcols


# ----------------------------------------------------------------------------
# Parameters (deterministic synthetic init)
# ----------------------------------------------------------------------------
def init_params(key, hidden, out_ch, game_in, state_in):
    ks = jax.random.split(key, 24)

    def w(i, shape):
        return jax.random.normal(ks[i], shape, jnp.float32) * 0.1

    p = {}
    p["w_rgcn_rel"] = w(0, (NUM_RELATIONS, game_in, hidden))
    p["w_rgcn_root"] = w(1, (game_in, hidden))
    p["b_rgcn"] = w(2, (1, hidden))
    p["w_tag1"] = w(3, (TAG_K + 1, game_in, hidden))
    p["b_tag1"] = w(4, (1, hidden))
    p["w3_rel"] = w(5, (hidden, hidden))
    p["b3_rel"] = w(6, (1, hidden))
    p["w3_root"] = w(7, (state_in, hidden))
    p["w32_l"] = w(8, (hidden, hidden)); p["b32_l"] = w(9, (1, hidden)); p["w32_r"] = w(10, (hidden, hidden))
    p["w4_l"] = w(11, (hidden, hidden)); p["b4_l"] = w(12, (1, hidden)); p["w4_r"] = w(13, (hidden, hidden))
    p["w42_l"] = w(14, (hidden, hidden)); p["b42_l"] = w(15, (1, hidden)); p["w42_r"] = w(16, (hidden, hidden))
    p["w_tag2"] = w(17, (TAG_K + 1, hidden, hidden)); p["b_tag2"] = w(18, (1, hidden))
    p["w5_l"] = w(19, (hidden, hidden)); p["b5_l"] = w(20, (1, hidden)); p["w5_r"] = w(21, (hidden, hidden))
    p["w_lin"] = w(22, (hidden, out_ch)); p["b_lin"] = w(23, (1, out_ch))
    return p


# ----------------------------------------------------------------------------
# Forward pass: ONE pallas_call
# ----------------------------------------------------------------------------
@jax.jit
def state_model_encoder(params, game_x, state_x,
                        edge_index_v_v, edge_type_v_v,
                        edge_index_history_v_s, edge_attr_history_v_s,
                        edge_index_in_v_s, edge_index_s_s):
    n_v, game_in = game_x.shape
    n_s, state_in = state_x.shape
    hidden, out_ch = params["w_lin"].shape

    dst_rows, src_cols, attr, max_e = _pack_edges(
        edge_index_v_v, edge_type_v_v, edge_index_history_v_s,
        edge_attr_history_v_s, edge_index_in_v_s, edge_index_s_s)
    slab, offs, rows, wcols = _pack_weight_slab(params, hidden, out_ch)

    kernel = _make_kernel(n_v, n_s, max_e, offs, rows, wcols)

    args = (game_x.astype(jnp.float32), state_x.astype(jnp.float32),
            dst_rows, src_cols, attr, slab)

    flops = 2 * (
        (NUM_RELATIONS + 1) * n_v * max_e * n_v            # v_v adjacency stack
        + 2 * n_s * max_e * n_v                            # history adjacency stack
        + n_s * max_e * n_v + n_s * max_e * n_s            # in / s_s adjacencies
        + (NUM_RELATIONS + TAG_K) * n_v * n_v * game_in    # relation agg + TAG hops
        + n_v * (NUM_RELATIONS + TAG_K + 1) * game_in * hidden   # game projection
        + 3 * n_s * n_v * hidden                           # batched state aggregations
        + 4 * n_s * (hidden + max(hidden, state_in)) * hidden    # fused convs
        + TAG_K * n_s * n_s * hidden                       # state TAG hops
        + n_s * (TAG_K + 1) * hidden * hidden              # TAG2 projection
        + n_s * n_s * hidden + n_s * 2 * hidden * hidden   # conv5
        + n_s * hidden * out_ch)                           # lin
    bytes_accessed = (sum(int(a.size) * a.dtype.itemsize for a in args)
                      + n_s * out_ch * 4)

    return pl.pallas_call(
        kernel,
        out_shape=jax.ShapeDtypeStruct((n_s, out_ch), jnp.float32),
        in_specs=[pl.BlockSpec(memory_space=pltpu.MemorySpace.VMEM)] * len(args),
        out_specs=pl.BlockSpec(memory_space=pltpu.MemorySpace.VMEM),
        compiler_params=pltpu.CompilerParams(vmem_limit_bytes=32 * 1024 * 1024),
        cost_estimate=pl.CostEstimate(flops=int(flops), transcendentals=0,
                                      bytes_accessed=int(bytes_accessed)),
    )(*args)


# ----------------------------------------------------------------------------
# Independent pure-JAX reference (scatter-based adjacencies, unpacked weights)
# ----------------------------------------------------------------------------
def _scatter_adj(src, dst, vals, n_dst, n_src):
    return jnp.zeros((n_dst, n_src), jnp.float32).at[dst, src].add(vals)


def _ref_weighted_adj(edge_index, weights, n_dst, n_src):
    return _scatter_adj(edge_index[0], edge_index[1],
                        weights.astype(jnp.float32), n_dst, n_src)


def _ref_mean_adj(edge_index, n_dst, n_src):
    ones = jnp.ones(edge_index.shape[1], jnp.float32)
    a = _scatter_adj(edge_index[0], edge_index[1], ones, n_dst, n_src)
    deg = a.sum(axis=1, keepdims=True)
    return a / jnp.maximum(deg, 1.0)


def _ref_rel_mean_adj(edge_index, edge_type, n):
    adjs = []
    for r in range(NUM_RELATIONS):
        vals = (edge_type == r).astype(jnp.float32)
        a = _scatter_adj(edge_index[0], edge_index[1], vals, n, n)
        deg = a.sum(axis=1, keepdims=True)
        adjs.append(a / jnp.maximum(deg, 1.0))
    return jnp.stack(adjs)


def _ref_gcn_norm_adj(edge_index, n):
    ones = jnp.ones(edge_index.shape[1], jnp.float32)
    a = _scatter_adj(edge_index[0], edge_index[1], ones, n, n)
    deg = a.sum(axis=1)
    dinv = jnp.where(deg > 0, 1.0 / jnp.sqrt(deg), 0.0)
    return dinv[:, None] * a * dinv[None, :]


def reference_forward(params, game_x, state_x,
                      edge_index_v_v, edge_type_v_v,
                      edge_index_history_v_s, edge_attr_history_v_s,
                      edge_index_in_v_s, edge_index_s_s):
    n_v, n_s = game_x.shape[0], state_x.shape[0]
    a_rel = _ref_rel_mean_adj(edge_index_v_v, edge_type_v_v, n_v)
    a_tag_v = _ref_gcn_norm_adj(edge_index_v_v, n_v)
    a_hist_w = _ref_weighted_adj(edge_index_history_v_s, edge_attr_history_v_s, n_s, n_v)
    a_hist_mean = _ref_mean_adj(edge_index_history_v_s, n_s, n_v)
    a_in_mean = _ref_mean_adj(edge_index_in_v_s, n_s, n_v)
    a_ss_norm = _ref_gcn_norm_adj(edge_index_s_s, n_s)
    a_ss_mean = _ref_mean_adj(edge_index_s_s, n_s, n_s)

    out = game_x @ params["w_rgcn_root"] + params["b_rgcn"]
    for r in range(NUM_RELATIONS):
        out += (a_rel[r] @ game_x) @ params["w_rgcn_rel"][r]
    out += game_x @ params["w_tag1"][0] + params["b_tag1"]
    h = game_x
    for k in range(1, TAG_K + 1):
        h = a_tag_v @ h
        out += h @ params["w_tag1"][k]
    game_h = out

    s = jnp.maximum((a_hist_w @ game_h) @ params["w3_rel"] + params["b3_rel"]
                    + state_x @ params["w3_root"], 0.0)
    s = jnp.maximum((a_hist_mean @ game_h) @ params["w32_l"] + params["b32_l"]
                    + s @ params["w32_r"], 0.0)
    s = jnp.maximum((a_in_mean @ game_h) @ params["w4_l"] + params["b4_l"]
                    + s @ params["w4_r"], 0.0)
    s = jnp.maximum((a_in_mean @ game_h) @ params["w42_l"] + params["b42_l"]
                    + s @ params["w42_r"], 0.0)
    out2 = s @ params["w_tag2"][0] + params["b_tag2"]
    h = s
    for k in range(1, TAG_K + 1):
        h = a_ss_norm @ h
        out2 += h @ params["w_tag2"][k]
    s = jnp.maximum(out2, 0.0)
    s = jnp.maximum((a_ss_mean @ s) @ params["w5_l"] + params["b5_l"]
                    + s @ params["w5_r"], 0.0)
    return s @ params["w_lin"] + params["b_lin"]


# ----------------------------------------------------------------------------
if __name__ == "__main__":
    key = jax.random.PRNGKey(0)
    keys = jax.random.split(key, 12)

    NV, NS = 16, 8            # game vertices / state vertices
    GAME_IN, STATE_IN = 5, 6  # game feature dim fixed at 5 by the module
    HIDDEN, OUT = 16, 8
    EVV, EH, EI, ESS = 40, 20, 12, 16

    game_x = jax.random.normal(keys[0], (NV, GAME_IN), jnp.float32)
    state_x = jax.random.normal(keys[1], (NS, STATE_IN), jnp.float32)
    edge_index_v_v = jax.random.randint(keys[2], (2, EVV), 0, NV)
    edge_type_v_v = jax.random.randint(keys[3], (EVV,), 0, NUM_RELATIONS)
    edge_index_history_v_s = jnp.stack([
        jax.random.randint(keys[4], (EH,), 0, NV),    # src: game vertex
        jax.random.randint(keys[5], (EH,), 0, NS),    # dst: state vertex
    ])
    edge_attr_history_v_s = jax.random.uniform(keys[6], (EH,), jnp.float32)
    edge_index_in_v_s = jnp.stack([
        jax.random.randint(keys[7], (EI,), 0, NV),
        jax.random.randint(keys[8], (EI,), 0, NS),
    ])
    edge_index_s_s = jax.random.randint(keys[9], (2, ESS), 0, NS)

    params = init_params(keys[10], HIDDEN, OUT, GAME_IN, STATE_IN)

    out = state_model_encoder(params, game_x, state_x,
                              edge_index_v_v, edge_type_v_v,
                              edge_index_history_v_s, edge_attr_history_v_s,
                              edge_index_in_v_s, edge_index_s_s)
    out = jax.block_until_ready(out)
    assert out.shape == (NS, OUT) and out.dtype == jnp.float32

    ref = reference_forward(params, game_x, state_x,
                            edge_index_v_v, edge_type_v_v,
                            edge_index_history_v_s, edge_attr_history_v_s,
                            edge_index_in_v_s, edge_index_s_s)
    assert jnp.allclose(out, ref, atol=2e-4, rtol=2e-4), "mismatch vs reference"

    print("KERNEL_OK")
</pallas_src>

<mosaic_0001>
module attributes {stable_mosaic.version = 11 : i64} {
  func.func @kernel(%arg0: memref<16x5xf32, #tpu.memory_space<vmem>>, %arg1: memref<8x6xf32, #tpu.memory_space<vmem>>, %arg2: memref<5x40xi32, #tpu.memory_space<vmem>>, %arg3: memref<40x4xi32, #tpu.memory_space<vmem>>, %arg4: memref<1x40xf32, #tpu.memory_space<vmem>>, %arg5: memref<280x16xf32, #tpu.memory_space<vmem>>, %arg6: memref<8x8xf32, #tpu.memory_space<vmem>>) attributes {dimension_semantics = [], scalar_prefetch = 0 : i64, scratch_operands = 0 : i64, tpu.core_type = #tpu.core_type<tc>} {
    %c0 = arith.constant 0 : index
    %c0_0 = arith.constant 0 : index
    %0 = vector.load %arg0[%c0, %c0_0] : memref<16x5xf32, #tpu.memory_space<vmem>>, vector<16x5xf32>
    %c0_1 = arith.constant 0 : index
    %c0_2 = arith.constant 0 : index
    %1 = vector.load %arg1[%c0_1, %c0_2] : memref<8x6xf32, #tpu.memory_space<vmem>>, vector<8x6xf32>
    %c0_3 = arith.constant 0 : index
    %c0_4 = arith.constant 0 : index
    %2 = vector.load %arg4[%c0_3, %c0_4] : memref<1x40xf32, #tpu.memory_space<vmem>>, vector<1x40xf32>
    %c1 = arith.constant 1 : index
    %c0_5 = arith.constant 0 : index
    %3 = vector.load %arg2[%c1, %c0_5] : memref<5x40xi32, #tpu.memory_space<vmem>>, vector<1x40xi32>
    %4 = tpu.iota {dimensions = array<i32: 0>} : vector<16x40xi32>
    %c0_6 = arith.constant 0 : index
    %c0_7 = arith.constant 0 : index
    %5 = vector.load %arg2[%c0_6, %c0_7] : memref<5x40xi32, #tpu.memory_space<vmem>>, vector<1x40xi32>
    %6 = vector.broadcast %5 : vector<1x40xi32> to vector<16x40xi32>
    %7 = arith.cmpi eq, %4, %6 : vector<16x40xi32>
    %cst = arith.constant 1.000000e+00 : f32
    %cst_8 = arith.constant 0.000000e+00 : f32
    %8 = vector.broadcast %cst : f32 to vector<16x40xf32>
    %9 = vector.broadcast %cst_8 : f32 to vector<16x40xf32>
    %10 = arith.select %7, %8, %9 : vector<16x40xi1>, vector<16x40xf32>
    %c0_i32 = arith.constant 0 : i32
    %11 = vector.broadcast %c0_i32 : i32 to vector<1x40xi32>
    %12 = arith.cmpi eq, %3, %11 : vector<1x40xi32>
    %cst_9 = arith.constant 1.000000e+00 : f32
    %cst_10 = arith.constant 0.000000e+00 : f32
    %13 = vector.broadcast %cst_9 : f32 to vector<1x40xf32>
    %14 = vector.broadcast %cst_10 : f32 to vector<1x40xf32>
    %15 = arith.select %12, %13, %14 : vector<1x40xi1>, vector<1x40xf32>
    %16 = vector.broadcast %15 : vector<1x40xf32> to vector<16x40xf32>
    %17 = arith.mulf %10, %16 : vector<16x40xf32>
    %c1_i32 = arith.constant 1 : i32
    %18 = vector.broadcast %c1_i32 : i32 to vector<1x40xi32>
    %19 = arith.cmpi eq, %3, %18 : vector<1x40xi32>
    %cst_11 = arith.constant 1.000000e+00 : f32
    %cst_12 = arith.constant 0.000000e+00 : f32
    %20 = vector.broadcast %cst_11 : f32 to vector<1x40xf32>
    %21 = vector.broadcast %cst_12 : f32 to vector<1x40xf32>
    %22 = arith.select %19, %20, %21 : vector<1x40xi1>, vector<1x40xf32>
    %23 = vector.broadcast %22 : vector<1x40xf32> to vector<16x40xf32>
    %24 = arith.mulf %10, %23 : vector<16x40xf32>
    %c2_i32 = arith.constant 2 : i32
    %25 = vector.broadcast %c2_i32 : i32 to vector<1x40xi32>
    %26 = arith.cmpi eq, %3, %25 : vector<1x40xi32>
    %cst_13 = arith.constant 1.000000e+00 : f32
    %cst_14 = arith.constant 0.000000e+00 : f32
    %27 = vector.broadcast %cst_13 : f32 to vector<1x40xf32>
    %28 = vector.broadcast %cst_14 : f32 to vector<1x40xf32>
    %29 = arith.select %26, %27, %28 : vector<1x40xi1>, vector<1x40xf32>
    %30 = vector.broadcast %29 : vector<1x40xf32> to vector<16x40xf32>
    %31 = arith.mulf %10, %30 : vector<16x40xf32>
    %32 = tpu.concatenate %17, %24, %31, %10 in 0 : vector<16x40xf32>, vector<16x40xf32>, vector<16x40xf32>, vector<16x40xf32> -> vector<64x40xf32>
    %33 = tpu.iota {dimensions = array<i32: 1>} : vector<40x16xi32>
    %c0_15 = arith.constant 0 : index
    %c0_16 = arith.constant 0 : index
    %34 = vector.load %arg3[%c0_15, %c0_16] : memref<40x4xi32, #tpu.memory_space<vmem>>, vector<40x1xi32>
    %35 = vector.broadcast %34 : vector<40x1xi32> to vector<40x16xi32>
    %36 = arith.cmpi eq, %33, %35 : vector<40x16xi32>
    %cst_17 = arith.constant 1.000000e+00 : f32
    %cst_18 = arith.constant 0.000000e+00 : f32
    %37 = vector.broadcast %cst_17 : f32 to vector<40x16xf32>
    %38 = vector.broadcast %cst_18 : f32 to vector<40x16xf32>
    %39 = arith.select %36, %37, %38 : vector<40x16xi1>, vector<40x16xf32>
    %cst_19 = arith.constant dense<0.000000e+00> : vector<64x16xf32>
    %40 = tpu.matmul %32, %39, %cst_19 {dimension_numbers = #tpu.dot_dimension_numbers<[1], [0], [0], [1], [0, 0, 1, 1], [], []>} : vector<64x40xf32>, vector<40x16xf32>, vector<64x16xf32> -> vector<64x16xf32>
    %41 = vector.extract_strided_slice %40 {offsets = [0, 0], sizes = [48, 16], strides = [1, 1]} : vector<64x16xf32> to vector<48x16xf32>
    %cst_20 = arith.constant dense<0.000000e+00> : vector<48xf32>
    %42 = vector.multi_reduction <add>, %41, %cst_20 [1] : vector<48x16xf32> to vector<48xf32>
    %43 = vector.shape_cast %42 : vector<48xf32> to vector<48x1xf32>
    %cst_21 = arith.constant 1.000000e+00 : f32
    %44 = vector.broadcast %cst_21 : f32 to vector<48x1xf32>
    %45 = arith.maximumf %43, %44 : vector<48x1xf32>
    %46 = vector.broadcast %45 : vector<48x1xf32> to vector<48x16xf32>
    %47 = arith.divf %41, %46 : vector<48x16xf32>
    %48 = vector.extract_strided_slice %40 {offsets = [48, 0], sizes = [16, 16], strides = [1, 1]} : vector<64x16xf32> to vector<16x16xf32>
    %cst_22 = arith.constant dense<0.000000e+00> : vector<16xf32>
    %49 = vector.multi_reduction <add>, %48, %cst_22 [1] : vector<16x16xf32> to vector<16xf32>
    %50 = vector.shape_cast %49 : vector<16xf32> to vector<16x1xf32>
    %cst_23 = arith.constant 0.000000e+00 : f32
    %51 = vector.broadcast %cst_23 : f32 to vector<16x1xf32>
    %52 = arith.cmpf ogt, %50, %51 : vector<16x1xf32>
    %cst_24 = arith.constant 1.000000e+00 : f32
    %53 = vector.broadcast %cst_24 : f32 to vector<16x1xf32>
    %54 = arith.maximumf %50, %53 : vector<16x1xf32>
    %55 = math.rsqrt %54 : vector<16x1xf32>
    %cst_25 = arith.constant 0.000000e+00 : f32
    %56 = vector.broadcast %cst_25 : f32 to vector<16x1xf32>
    %57 = arith.select %52, %55, %56 : vector<16x1xi1>, vector<16x1xf32>
    %58 = tpu.iota {dimensions = array<i32: 0>} : vector<8x40xi32>
    %c2 = arith.constant 2 : index
    %c0_26 = arith.constant 0 : index
    %59 = vector.load %arg2[%c2, %c0_26] : memref<5x40xi32, #tpu.memory_space<vmem>>, vector<1x40xi32>
    %60 = vector.broadcast %59 : vector<1x40xi32> to vector<8x40xi32>
    %61 = arith.cmpi eq, %58, %60 : vector<8x40xi32>
    %cst_27 = arith.constant 1.000000e+00 : f32
    %cst_28 = arith.constant 0.000000e+00 : f32
    %62 = vector.broadcast %cst_27 : f32 to vector<8x40xf32>
    %63 = vector.broadcast %cst_28 : f32 to vector<8x40xf32>
    %64 = arith.select %61, %62, %63 : vector<8x40xi1>, vector<8x40xf32>
    %65 = vector.broadcast %2 : vector<1x40xf32> to vector<8x40xf32>
    %66 = arith.mulf %64, %65 : vector<8x40xf32>
    %67 = tpu.concatenate %66, %64 in 0 : vector<8x40xf32>, vector<8x40xf32> -> vector<16x40xf32>
    %68 = tpu.iota {dimensions = array<i32: 1>} : vector<40x16xi32>
    %c0_29 = arith.constant 0 : index
    %c1_30 = arith.constant 1 : index
    %69 = vector.load %arg3[%c0_29, %c1_30] : memref<40x4xi32, #tpu.memory_space<vmem>>, vector<40x1xi32>
    %70 = vector.broadcast %69 : vector<40x1xi32> to vector<40x16xi32>
    %71 = arith.cmpi eq, %68, %70 : vector<40x16xi32>
    %cst_31 = arith.constant 1.000000e+00 : f32
    %cst_32 = arith.constant 0.000000e+00 : f32
    %72 = vector.broadcast %cst_31 : f32 to vector<40x16xf32>
    %73 = vector.broadcast %cst_32 : f32 to vector<40x16xf32>
    %74 = arith.select %71, %72, %73 : vector<40x16xi1>, vector<40x16xf32>
    %cst_33 = arith.constant dense<0.000000e+00> : vector<16x16xf32>
    %75 = tpu.matmul %67, %74, %cst_33 {dimension_numbers = #tpu.dot_dimension_numbers<[1], [0], [0], [1], [0, 0, 1, 1], [], []>} : vector<16x40xf32>, vector<40x16xf32>, vector<16x16xf32> -> vector<16x16xf32>
    %76 = vector.extract_strided_slice %75 {offsets = [0, 0], sizes = [8, 16], strides = [1, 1]} : vector<16x16xf32> to vector<8x16xf32>
    %77 = vector.extract_strided_slice %75 {offsets = [8, 0], sizes = [8, 16], strides = [1, 1]} : vector<16x16xf32> to vector<8x16xf32>
    %cst_34 = arith.constant dense<0.000000e+00> : vector<8xf32>
    %78 = vector.multi_reduction <add>, %77, %cst_34 [1] : vector<8x16xf32> to vector<8xf32>
    %79 = vector.shape_cast %78 : vector<8xf32> to vector<8x1xf32>
    %cst_35 = arith.constant 1.000000e+00 : f32
    %80 = vector.broadcast %cst_35 : f32 to vector<8x1xf32>
    %81 = arith.maximumf %79, %80 : vector<8x1xf32>
    %82 = vector.broadcast %81 : vector<8x1xf32> to vector<8x16xf32>
    %83 = arith.divf %77, %82 : vector<8x16xf32>
    %84 = tpu.iota {dimensions = array<i32: 0>} : vector<8x40xi32>
    %c3 = arith.constant 3 : index
    %c0_36 = arith.constant 0 : index
    %85 = vector.load %arg2[%c3, %c0_36] : memref<5x40xi32, #tpu.memory_space<vmem>>, vector<1x40xi32>
    %86 = vector.broadcast %85 : vector<1x40xi32> to vector<8x40xi32>
    %87 = arith.cmpi eq, %84, %86 : vector<8x40xi32>
    %cst_37 = arith.constant 1.000000e+00 : f32
    %cst_38 = arith.constant 0.000000e+00 : f32
    %88 = vector.broadcast %cst_37 : f32 to vector<8x40xf32>
    %89 = vector.broadcast %cst_38 : f32 to vector<8x40xf32>
    %90 = arith.select %87, %88, %89 : vector<8x40xi1>, vector<8x40xf32>
    %91 = tpu.iota {dimensions = array<i32: 1>} : vector<40x16xi32>
    %c0_39 = arith.constant 0 : index
    %c2_40 = arith.constant 2 : index
    %92 = vector.load %arg3[%c0_39, %c2_40] : memref<40x4xi32, #tpu.memory_space<vmem>>, vector<40x1xi32>
    %93 = vector.broadcast %92 : vector<40x1xi32> to vector<40x16xi32>
    %94 = arith.cmpi eq, %91, %93 : vector<40x16xi32>
    %cst_41 = arith.constant 1.000000e+00 : f32
    %cst_42 = arith.constant 0.000000e+00 : f32
    %95 = vector.broadcast %cst_41 : f32 to vector<40x16xf32>
    %96 = vector.broadcast %cst_42 : f32 to vector<40x16xf32>
    %97 = arith.select %94, %95, %96 : vector<40x16xi1>, vector<40x16xf32>
    %cst_43 = arith.constant dense<0.000000e+00> : vector<8x16xf32>
    %98 = tpu.matmul %90, %97, %cst_43 {dimension_numbers = #tpu.dot_dimension_numbers<[1], [0], [0], [1], [0, 0, 1, 1], [], []>} : vector<8x40xf32>, vector<40x16xf32>, vector<8x16xf32> -> vector<8x16xf32>
    %cst_44 = arith.constant dense<0.000000e+00> : vector<8xf32>
    %99 = vector.multi_reduction <add>, %98, %cst_44 [1] : vector<8x16xf32> to vector<8xf32>
    %100 = vector.shape_cast %99 : vector<8xf32> to vector<8x1xf32>
    %cst_45 = arith.constant 1.000000e+00 : f32
    %101 = vector.broadcast %cst_45 : f32 to vector<8x1xf32>
    %102 = arith.maximumf %100, %101 : vector<8x1xf32>
    %103 = vector.broadcast %102 : vector<8x1xf32> to vector<8x16xf32>
    %104 = arith.divf %98, %103 : vector<8x16xf32>
    %105 = tpu.iota {dimensions = array<i32: 0>} : vector<8x40xi32>
    %c4 = arith.constant 4 : index
    %c0_46 = arith.constant 0 : index
    %106 = vector.load %arg2[%c4, %c0_46] : memref<5x40xi32, #tpu.memory_space<vmem>>, vector<1x40xi32>
    %107 = vector.broadcast %106 : vector<1x40xi32> to vector<8x40xi32>
    %108 = arith.cmpi eq, %105, %107 : vector<8x40xi32>
    %cst_47 = arith.constant 1.000000e+00 : f32
    %cst_48 = arith.constant 0.000000e+00 : f32
    %109 = vector.broadcast %cst_47 : f32 to vector<8x40xf32>
    %110 = vector.broadcast %cst_48 : f32 to vector<8x40xf32>
    %111 = arith.select %108, %109, %110 : vector<8x40xi1>, vector<8x40xf32>
    %112 = tpu.iota {dimensions = array<i32: 1>} : vector<40x8xi32>
    %c0_49 = arith.constant 0 : index
    %c3_50 = arith.constant 3 : index
    %113 = vector.load %arg3[%c0_49, %c3_50] : memref<40x4xi32, #tpu.memory_space<vmem>>, vector<40x1xi32>
    %114 = vector.broadcast %113 : vector<40x1xi32> to vector<40x8xi32>
    %115 = arith.cmpi eq, %112, %114 : vector<40x8xi32>
    %cst_51 = arith.constant 1.000000e+00 : f32
    %cst_52 = arith.constant 0.000000e+00 : f32
    %116 = vector.broadcast %cst_51 : f32 to vector<40x8xf32>
    %117 = vector.broadcast %cst_52 : f32 to vector<40x8xf32>
    %118 = arith.select %115, %116, %117 : vector<40x8xi1>, vector<40x8xf32>
    %cst_53 = arith.constant dense<0.000000e+00> : vector<8x8xf32>
    %119 = tpu.matmul %111, %118, %cst_53 {dimension_numbers = #tpu.dot_dimension_numbers<[1], [0], [0], [1], [0, 0, 1, 1], [], []>} : vector<8x40xf32>, vector<40x8xf32>, vector<8x8xf32> -> vector<8x8xf32>
    %cst_54 = arith.constant dense<0.000000e+00> : vector<8xf32>
    %120 = vector.multi_reduction <add>, %119, %cst_54 [1] : vector<8x8xf32> to vector<8xf32>
    %121 = vector.shape_cast %120 : vector<8xf32> to vector<8x1xf32>
    %cst_55 = arith.constant 1.000000e+00 : f32
    %122 = vector.broadcast %cst_55 : f32 to vector<8x1xf32>
    %123 = arith.maximumf %121, %122 : vector<8x1xf32>
    %124 = vector.broadcast %123 : vector<8x1xf32> to vector<8x8xf32>
    %125 = arith.divf %119, %124 : vector<8x8xf32>
    %cst_56 = arith.constant dense<0.000000e+00> : vector<8xf32>
    %126 = vector.multi_reduction <add>, %119, %cst_56 [1] : vector<8x8xf32> to vector<8xf32>
    %127 = vector.shape_cast %126 : vector<8xf32> to vector<8x1xf32>
    %cst_57 = arith.constant 0.000000e+00 : f32
    %128 = vector.broadcast %cst_57 : f32 to vector<8x1xf32>
    %129 = arith.cmpf ogt, %127, %128 : vector<8x1xf32>
    %cst_58 = arith.constant 1.000000e+00 : f32
    %130 = vector.broadcast %cst_58 : f32 to vector<8x1xf32>
    %131 = arith.maximumf %127, %130 : vector<8x1xf32>
    %132 = math.rsqrt %131 : vector<8x1xf32>
    %cst_59 = arith.constant 0.000000e+00 : f32
    %133 = vector.broadcast %cst_59 : f32 to vector<8x1xf32>
    %134 = arith.select %129, %132, %133 : vector<8x1xi1>, vector<8x1xf32>
    %cst_60 = arith.constant dense<0.000000e+00> : vector<48x5xf32>
    %135 = tpu.matmul %47, %0, %cst_60 {dimension_numbers = #tpu.dot_dimension_numbers<[1], [0], [0], [1], [0, 0, 1, 1], [], []>} : vector<48x16xf32>, vector<16x5xf32>, vector<48x5xf32> -> vector<48x5xf32>
    %136 = vector.broadcast %57 : vector<16x1xf32> to vector<16x5xf32>
    %137 = arith.mulf %136, %0 : vector<16x5xf32>
    %cst_61 = arith.constant dense<0.000000e+00> : vector<16x5xf32>
    %138 = tpu.matmul %48, %137, %cst_61 {dimension_numbers = #tpu.dot_dimension_numbers<[1], [0], [0], [1], [0, 0, 1, 1], [], []>} : vector<16x16xf32>, vector<16x5xf32>, vector<16x5xf32> -> vector<16x5xf32>
    %139 = vector.broadcast %57 : vector<16x1xf32> to vector<16x5xf32>
    %140 = arith.mulf %139, %138 : vector<16x5xf32>
    %141 = vector.broadcast %57 : vector<16x1xf32> to vector<16x5xf32>
    %142 = arith.mulf %141, %140 : vector<16x5xf32>
    %cst_62 = arith.constant dense<0.000000e+00> : vector<16x5xf32>
    %143 = tpu.matmul %48, %142, %cst_62 {dimension_numbers = #tpu.dot_dimension_numbers<[1], [0], [0], [1], [0, 0, 1, 1], [], []>} : vector<16x16xf32>, vector<16x5xf32>, vector<16x5xf32> -> vector<16x5xf32>
    %144 = vector.broadcast %57 : vector<16x1xf32> to vector<16x5xf32>
    %145 = arith.mulf %144, %143 : vector<16x5xf32>
    %146 = vector.broadcast %57 : vector<16x1xf32> to vector<16x5xf32>
    %147 = arith.mulf %146, %145 : vector<16x5xf32>
    %cst_63 = arith.constant dense<0.000000e+00> : vector<16x5xf32>
    %148 = tpu.matmul %48, %147, %cst_63 {dimension_numbers = #tpu.dot_dimension_numbers<[1], [0], [0], [1], [0, 0, 1, 1], [], []>} : vector<16x16xf32>, vector<16x5xf32>, vector<16x5xf32> -> vector<16x5xf32>
    %149 = vector.broadcast %57 : vector<16x1xf32> to vector<16x5xf32>
    %150 = arith.mulf %149, %148 : vector<16x5xf32>
    %151 = vector.extract_strided_slice %135 {offsets = [0, 0], sizes = [16, 5], strides = [1, 1]} : vector<48x5xf32> to vector<16x5xf32>
    %152 = vector.extract_strided_slice %135 {offsets = [16, 0], sizes = [16, 5], strides = [1, 1]} : vector<48x5xf32> to vector<16x5xf32>
    %153 = vector.extract_strided_slice %135 {offsets = [32, 0], sizes = [16, 5], strides = [1, 1]} : vector<48x5xf32> to vector<16x5xf32>
    %154 = tpu.concatenate %0, %151, %152, %153, %140, %145, %150 in 1 : vector<16x5xf32>, vector<16x5xf32>, vector<16x5xf32>, vector<16x5xf32>, vector<16x5xf32>, vector<16x5xf32>, vector<16x5xf32> -> vector<16x35xf32>
    %c0_64 = arith.constant 0 : index
    %c0_65 = arith.constant 0 : index
    %155 = vector.load %arg5[%c0_64, %c0_65] : memref<280x16xf32, #tpu.memory_space<vmem>>, vector<35x16xf32>
    %cst_66 = arith.constant dense<0.000000e+00> : vector<16x16xf32>
    %156 = tpu.matmul %154, %155, %cst_66 {dimension_numbers = #tpu.dot_dimension_numbers<[1], [0], [0], [1], [0, 0, 1, 1], [], []>} : vector<16x35xf32>, vector<35x16xf32>, vector<16x16xf32> -> vector<16x16xf32>
    %c272 = arith.constant 272 : index
    %c0_67 = arith.constant 0 : index
    %157 = vector.load %arg5[%c272, %c0_67] : memref<280x16xf32, #tpu.memory_space<vmem>>, vector<1x16xf32>
    %158 = vector.broadcast %157 : vector<1x16xf32> to vector<16x16xf32>
    %159 = arith.addf %156, %158 : vector<16x16xf32>
    %160 = tpu.concatenate %76, %83, %104 in 0 : vector<8x16xf32>, vector<8x16xf32>, vector<8x16xf32> -> vector<24x16xf32>
    %cst_68 = arith.constant dense<0.000000e+00> : vector<24x16xf32>
    %161 = tpu.matmul %160, %159, %cst_68 {dimension_numbers = #tpu.dot_dimension_numbers<[1], [0], [0], [1], [0, 0, 1, 1], [], []>} : vector<24x16xf32>, vector<16x16xf32>, vector<24x16xf32> -> vector<24x16xf32>
    %162 = vector.extract_strided_slice %161 {offsets = [0, 0], sizes = [8, 16], strides = [1, 1]} : vector<24x16xf32> to vector<8x16xf32>
    %163 = tpu.concatenate %162, %1 in 1 : vector<8x16xf32>, vector<8x6xf32> -> vector<8x22xf32>
    %c40 = arith.constant 40 : index
    %c0_69 = arith.constant 0 : index
    %164 = vector.load %arg5[%c40, %c0_69] : memref<280x16xf32, #tpu.memory_space<vmem>>, vector<22x16xf32>
    %cst_70 = arith.constant dense<0.000000e+00> : vector<8x16xf32>
    %165 = tpu.matmul %163, %164, %cst_70 {dimension_numbers = #tpu.dot_dimension_numbers<[1], [0], [0], [1], [0, 0, 1, 1], [], []>} : vector<8x22xf32>, vector<22x16xf32>, vector<8x16xf32> -> vector<8x16xf32>
    %c273 = arith.constant 273 : index
    %c0_71 = arith.constant 0 : index
    %166 = vector.load %arg5[%c273, %c0_71] : memref<280x16xf32, #tpu.memory_space<vmem>>, vector<1x16xf32>
    %167 = vector.broadcast %166 : vector<1x16xf32> to vector<8x16xf32>
    %168 = arith.addf %165, %167 : vector<8x16xf32>
    %cst_72 = arith.constant 0.000000e+00 : f32
    %169 = vector.broadcast %cst_72 : f32 to vector<8x16xf32>
    %170 = arith.maximumf %168, %169 : vector<8x16xf32>
    %171 = vector.extract_strided_slice %161 {offsets = [8, 0], sizes = [8, 16], strides = [1, 1]} : vector<24x16xf32> to vector<8x16xf32>
    %172 = tpu.concatenate %171, %170 in 1 : vector<8x16xf32>, vector<8x16xf32> -> vector<8x32xf32>
    %c64 = arith.constant 64 : index
    %c0_73 = arith.constant 0 : index
    %173 = vector.load %arg5[%c64, %c0_73] : memref<280x16xf32, #tpu.memory_space<vmem>>, vector<32x16xf32>
    %cst_74 = arith.constant dense<0.000000e+00> : vector<8x16xf32>
    %174 = tpu.matmul %172, %173, %cst_74 {dimension_numbers = #tpu.dot_dimension_numbers<[1], [0], [0], [1], [0, 0, 1, 1], [], []>} : vector<8x32xf32>, vector<32x16xf32>, vector<8x16xf32> -> vector<8x16xf32>
    %c274 = arith.constant 274 : index
    %c0_75 = arith.constant 0 : index
    %175 = vector.load %arg5[%c274, %c0_75] : memref<280x16xf32, #tpu.memory_space<vmem>>, vector<1x16xf32>
    %176 = vector.broadcast %175 : vector<1x16xf32> to vector<8x16xf32>
    %177 = arith.addf %174, %176 : vector<8x16xf32>
    %cst_76 = arith.constant 0.000000e+00 : f32
    %178 = vector.broadcast %cst_76 : f32 to vector<8x16xf32>
    %179 = arith.maximumf %177, %178 : vector<8x16xf32>
    %180 = vector.extract_strided_slice %161 {offsets = [16, 0], sizes = [8, 16], strides = [1, 1]} : vector<24x16xf32> to vector<8x16xf32>
    %181 = tpu.concatenate %180, %179 in 1 : vector<8x16xf32>, vector<8x16xf32> -> vector<8x32xf32>
    %c96 = arith.constant 96 : index
    %c0_77 = arith.constant 0 : index
    %182 = vector.load %arg5[%c96, %c0_77] : memref<280x16xf32, #tpu.memory_space<vmem>>, vector<32x16xf32>
    %cst_78 = arith.constant dense<0.000000e+00> : vector<8x16xf32>
    %183 = tpu.matmul %181, %182, %cst_78 {dimension_numbers = #tpu.dot_dimension_numbers<[1], [0], [0], [1], [0, 0, 1, 1], [], []>} : vector<8x32xf32>, vector<32x16xf32>, vector<8x16xf32> -> vector<8x16xf32>
    %c275 = arith.constant 275 : index
    %c0_79 = arith.constant 0 : index
    %184 = vector.load %arg5[%c275, %c0_79] : memref<280x16xf32, #tpu.memory_space<vmem>>, vector<1x16xf32>
    %185 = vector.broadcast %184 : vector<1x16xf32> to vector<8x16xf32>
    %186 = arith.addf %183, %185 : vector<8x16xf32>
    %cst_80 = arith.constant 0.000000e+00 : f32
    %187 = vector.broadcast %cst_80 : f32 to vector<8x16xf32>
    %188 = arith.maximumf %186, %187 : vector<8x16xf32>
    %189 = vector.extract_strided_slice %161 {offsets = [16, 0], sizes = [8, 16], strides = [1, 1]} : vector<24x16xf32> to vector<8x16xf32>
    %190 = tpu.concatenate %189, %188 in 1 : vector<8x16xf32>, vector<8x16xf32> -> vector<8x32xf32>
    %c128 = arith.constant 128 : index
    %c0_81 = arith.constant 0 : index
    %191 = vector.load %arg5[%c128, %c0_81] : memref<280x16xf32, #tpu.memory_space<vmem>>, vector<32x16xf32>
    %cst_82 = arith.constant dense<0.000000e+00> : vector<8x16xf32>
    %192 = tpu.matmul %190, %191, %cst_82 {dimension_numbers = #tpu.dot_dimension_numbers<[1], [0], [0], [1], [0, 0, 1, 1], [], []>} : vector<8x32xf32>, vector<32x16xf32>, vector<8x16xf32> -> vector<8x16xf32>
    %c276 = arith.constant 276 : index
    %c0_83 = arith.constant 0 : index
    %193 = vector.load %arg5[%c276, %c0_83] : memref<280x16xf32, #tpu.memory_space<vmem>>, vector<1x16xf32>
    %194 = vector.broadcast %193 : vector<1x16xf32> to vector<8x16xf32>
    %195 = arith.addf %192, %194 : vector<8x16xf32>
    %cst_84 = arith.constant 0.000000e+00 : f32
    %196 = vector.broadcast %cst_84 : f32 to vector<8x16xf32>
    %197 = arith.maximumf %195, %196 : vector<8x16xf32>
    %198 = vector.broadcast %134 : vector<8x1xf32> to vector<8x16xf32>
    %199 = arith.mulf %198, %197 : vector<8x16xf32>
    %cst_85 = arith.constant dense<0.000000e+00> : vector<8x16xf32>
    %200 = tpu.matmul %119, %199, %cst_85 {dimension_numbers = #tpu.dot_dimension_numbers<[1], [0], [0], [1], [0, 0, 1, 1], [], []>} : vector<8x8xf32>, vector<8x16xf32>, vector<8x16xf32> -> vector<8x16xf32>
    %201 = vector.broadcast %134 : vector<8x1xf32> to vector<8x16xf32>
    %202 = arith.mulf %201, %200 : vector<8x16xf32>
    %203 = vector.broadcast %134 : vector<8x1xf32> to vector<8x16xf32>
    %204 = arith.mulf %203, %202 : vector<8x16xf32>
    %cst_86 = arith.constant dense<0.000000e+00> : vector<8x16xf32>
    %205 = tpu.matmul %119, %204, %cst_86 {dimension_numbers = #tpu.dot_dimension_numbers<[1], [0], [0], [1], [0, 0, 1, 1], [], []>} : vector<8x8xf32>, vector<8x16xf32>, vector<8x16xf32> -> vector<8x16xf32>
    %206 = vector.broadcast %134 : vector<8x1xf32> to vector<8x16xf32>
    %207 = arith.mulf %206, %205 : vector<8x16xf32>
    %208 = vector.broadcast %134 : vector<8x1xf32> to vector<8x16xf32>
    %209 = arith.mulf %208, %207 : vector<8x16xf32>
    %cst_87 = arith.constant dense<0.000000e+00> : vector<8x16xf32>
    %210 = tpu.matmul %119, %209, %cst_87 {dimension_numbers = #tpu.dot_dimension_numbers<[1], [0], [0], [1], [0, 0, 1, 1], [], []>} : vector<8x8xf32>, vector<8x16xf32>, vector<8x16xf32> -> vector<8x16xf32>
    %211 = vector.broadcast %134 : vector<8x1xf32> to vector<8x16xf32>
    %212 = arith.mulf %211, %210 : vector<8x16xf32>
    %213 = tpu.concatenate %197, %202, %207, %212 in 1 : vector<8x16xf32>, vector<8x16xf32>, vector<8x16xf32>, vector<8x16xf32> -> vector<8x64xf32>
    %c160 = arith.constant 160 : index
    %c0_88 = arith.constant 0 : index
    %214 = vector.load %arg5[%c160, %c0_88] : memref<280x16xf32, #tpu.memory_space<vmem>>, vector<64x16xf32>
    %cst_89 = arith.constant dense<0.000000e+00> : vector<8x16xf32>
    %215 = tpu.matmul %213, %214, %cst_89 {dimension_numbers = #tpu.dot_dimension_numbers<[1], [0], [0], [1], [0, 0, 1, 1], [], []>} : vector<8x64xf32>, vector<64x16xf32>, vector<8x16xf32> -> vector<8x16xf32>
    %c277 = arith.constant 277 : index
    %c0_90 = arith.constant 0 : index
    %216 = vector.load %arg5[%c277, %c0_90] : memref<280x16xf32, #tpu.memory_space<vmem>>, vector<1x16xf32>
    %217 = vector.broadcast %216 : vector<1x16xf32> to vector<8x16xf32>
    %218 = arith.addf %215, %217 : vector<8x16xf32>
    %cst_91 = arith.constant 0.000000e+00 : f32
    %219 = vector.broadcast %cst_91 : f32 to vector<8x16xf32>
    %220 = arith.maximumf %218, %219 : vector<8x16xf32>
    %cst_92 = arith.constant dense<0.000000e+00> : vector<8x16xf32>
    %221 = tpu.matmul %125, %220, %cst_92 {dimension_numbers = #tpu.dot_dimension_numbers<[1], [0], [0], [1], [0, 0, 1, 1], [], []>} : vector<8x8xf32>, vector<8x16xf32>, vector<8x16xf32> -> vector<8x16xf32>
    %222 = tpu.concatenate %221, %220 in 1 : vector<8x16xf32>, vector<8x16xf32> -> vector<8x32xf32>
    %c224 = arith.constant 224 : index
    %c0_93 = arith.constant 0 : index
    %223 = vector.load %arg5[%c224, %c0_93] : memref<280x16xf32, #tpu.memory_space<vmem>>, vector<32x16xf32>
    %cst_94 = arith.constant dense<0.000000e+00> : vector<8x16xf32>
    %224 = tpu.matmul %222, %223, %cst_94 {dimension_numbers = #tpu.dot_dimension_numbers<[1], [0], [0], [1], [0, 0, 1, 1], [], []>} : vector<8x32xf32>, vector<32x16xf32>, vector<8x16xf32> -> vector<8x16xf32>
    %c278 = arith.constant 278 : index
    %c0_95 = arith.constant 0 : index
    %225 = vector.load %arg5[%c278, %c0_95] : memref<280x16xf32, #tpu.memory_space<vmem>>, vector<1x16xf32>
    %226 = vector.broadcast %225 : vector<1x16xf32> to vector<8x16xf32>
    %227 = arith.addf %224, %226 : vector<8x16xf32>
    %cst_96 = arith.constant 0.000000e+00 : f32
    %228 = vector.broadcast %cst_96 : f32 to vector<8x16xf32>
    %229 = arith.maximumf %227, %228 : vector<8x16xf32>
    %c256 = arith.constant 256 : index
    %c0_97 = arith.constant 0 : index
    %230 = vector.load %arg5[%c256, %c0_97] : memref<280x16xf32, #tpu.memory_space<vmem>>, vector<16x8xf32>
    %cst_98 = arith.constant dense<0.000000e+00> : vector<8x8xf32>
    %231 = tpu.matmul %229, %230, %cst_98 {dimension_numbers = #tpu.dot_dimension_numbers<[1], [0], [0], [1], [0, 0, 1, 1], [], []>} : vector<8x16xf32>, vector<16x8xf32>, vector<8x8xf32> -> vector<8x8xf32>
    %c279 = arith.constant 279 : index
    %c0_99 = arith.constant 0 : index
    %232 = vector.load %arg5[%c279, %c0_99] : memref<280x16xf32, #tpu.memory_space<vmem>>, vector<1x8xf32>
    %233 = vector.broadcast %232 : vector<1x8xf32> to vector<8x8xf32>
    %234 = arith.addf %231, %233 : vector<8x8xf32>
    %c0_100 = arith.constant 0 : index
    %c0_101 = arith.constant 0 : index
    %235 = vector.load %arg6[%c0_100, %c0_101] : memref<8x8xf32, #tpu.memory_space<vmem>>, vector<8x8xf32>
    tpu.vector_store %arg6[%c0_100, %c0_101], %234 {strides = array<i32>} : memref<8x8xf32, #tpu.memory_space<vmem>>, vector<8x8xf32>,
    return
  }
}

</mosaic_0001>

<bundles_post_ra>
// kernel: state_model_encoder.1
= control target key start
LH: loop header
LB: loop body
LE: loop exit
PB: predicated region body
PF: predicated region fallthrough
CT: control target
= control target key end

     0   :  { %v2749_v2 = vmov 0   ;;  %s3282_s0 = inlined_call_operand.vmem [shape: f32[16,5], index: 0, kind: input, shape index: {}]   ;;  %s3283_s1 = inlined_call_operand.vmem [shape: f32[8,6], index: 1, kind: input, shape index: {}]   ;;  %s3284_s2 = inlined_call_operand.vmem [shape: s32[5,40], index: 2, kind: input, shape index: {}]   ;;  %s3285_s3 = inlined_call_operand.vmem [shape: s32[40,4], index: 3, kind: input, shape index: {}]   ;;  %s3286_s4 = inlined_call_operand.vmem [shape: f32[1,40], index: 4, kind: input, shape index: {}]   ;;  %s3287_s5 = inlined_call_operand.vmem [shape: f32[280,16], index: 5, kind: input, shape index: {}]   ;;  %s3288_s6 = inlined_call_operand.hbm [shape: f32[8,8], index: 6, kind: output, shape index: {}]  }
   0x1   :  { %v2806_v0 = vld [vmem:[%s3285_s3 + $0x10] sm:$0xff]  ;;  %v2811_v1 = vld [vmem:[%s3285_s3] sm:$0xff]  ;;  %2693 = vset.pattern.permute.xlu1 %v2749_v2  ;;  %2692 = vset.pattern.permute.xlu0 %v2749_v2 }
   0x2   :  { %11 = vsyncpa [#allocation3], 0  ;;  %79 = vperm.xlu1 %2693, %v2806_v0   ;;  %73 = vperm.xlu0 %2692, %v2811_v1   ;;  %v2818_v3 = vld [vmem:[%s3285_s3 + $0x18] sm:$0xff]  ;;  %v2823_v4 = vld [vmem:[%s3285_s3 + $0x8] sm:$0xff]  ;;  %v29_v6 = vlaneseq  ;;  %v2750_v12 = vmov 0.0   ;;  %vm97_vm4 = vcmask 326656  }
   0x3   :  { %v2830_v5 = vld [vmem:[%s3285_s3 + $0x20] sm:$0xff]  ;;  %v2751_v25 = vmov 3   ;;  %v2752_v31 = vmov 1.0|1.0   ;;  %v2753_v33 = vmov 1.0   ;;  %vm227_vm13 = vcmask 130048  }
   0x4   :  { %v2833_v7 = vshrl.u32 %v29_v6, 7  ;;  %v28_v8 = vld [vmem:[%s3284_s2 + $0x1] sm:$0x1]  ;;  %v2173_v11 = vld [vmem:[%s3284_s2] ss:$0 sm:$0xff]  ;;  %v2855_v28 = vand.u32 127, %v29_v6 }
   0x5   :  { %vm41_vm0 = vcmp.eq.s32.totalorder %v28_v8, 0  ;;  %vm49_vm3 = vcmp.eq.s32.totalorder %v28_v8, 1  ;;  %vm57_vm5 = vcmp.eq.s32.totalorder %v28_v8, 2  ;;  %v2754_v46 = vmov 1   ;;  %v2187_v58 = vld [vmem:[%s3284_s2 + $0x2] ss:$0 sm:$0xff] }
   0x6   :  { %82 = vperm.xlu1 %2693, %v2818_v3   ;;  %76 = vperm.xlu0 %2692, %v2823_v4   ;;  %v45_v9 = vsub.s32 0, %v2833_v7  ;;  %v31_v10 = vadd.s32 8, %v2833_v7  ;;  %v42_v13 = vsel %vm41_vm0, 1.0, %v2750_v12  ;;  %vm37_vm1 = vcmp.eq.s32.totalorder %v2833_v7, %v2173_v11  ;;  %v2188_v62 = vld [vmem:[%s3286_s4] ss:$0 sm:$0xff]  ;;  %s2759_s20 = smov 10  }
   0x7   :  { %v39_v15 = vsel %vm37_vm1, 1.0, %v2750_v12  ;;  %v50_v19 = vsel %vm49_vm3, 1.0, %v2750_v12  ;;  %v58_v22 = vsel %vm57_vm5, 1.0, %v2750_v12  ;;  %v2755_v47 = vmov 0.0|0.0   ;;  %v2950_v6 = vld [vmem:[%s3282_s0] sm:$0xff]  ;;  %s2760_s21 = smov 15  }
   0x8   :  { %v46_v14 = vrot.slane %v42_v13, %v45_v9  ;;  %vm38_vm2 = vcmp.eq.s32.totalorder %v31_v10, %v2173_v11  ;;  %v54_v20 = vrot.slane %v50_v19, %v45_v9  ;;  %v62_v23 = vrot.slane %v58_v22, %v45_v9  ;;  %s2761_s22 = smov 20   ;;  %s2762_s23 = smov 25  }
   0x9   :  { %v40_v16 = vsel %vm38_vm2, 1.0, %v2750_v12  ;;  %vm2756_vm14 = vmmov 0   ;;  %v2757_v51 = vmov 2   ;;  %vm283_vm15 = vcmp.eq.s32.totalorder %v2833_v7, %v2187_v58  ;;  %s2763_s10 = smov 30   ;;  %s2764_s12 = smov 16  }
   0xa   :  { %85 = vperm.xlu0 %2692, %v2830_v5   ;;  %v47_v17 = vmul.f32 %v46_v14, %v39_v15  ;;  %v48_v18 = vmul.f32 %v46_v14, %v40_v16  ;;  %v56_v21 = vmul.f32 %v54_v20, %v40_v16  ;;  %v64_v24 = vmul.f32 %v62_v23, %v40_v16  ;;  %s2766_s13 = smov 48   ;;  %s2767_s28 = smov [#allocation2]  }
   0xb   :  { %2695 = vset.pattern.permute.xlu1 %v2751_v25  ;;  %v55_v34 = vmul.f32 %v54_v20, %v39_v15  ;;  %v63_v35 = vmul.f32 %v62_v23, %v39_v15  ;;  %v2926_v63 = vsel %vm283_vm15, 1.0, %v2750_v12  ;;  %s2165_s29 = sshll.u32 %s2767_s28, 4  ;;  %s2166_s29 = int_to_ptr.vmem [resolvable:$true] %s2165_s29 }
   0xc   :  { %2366 = vmatprep.mubr.msk.f32.mxu0 %vm97_vm4, %v47_v17  ;;  %526 = vperm.xlu1 %2695, %v2823_v4   ;;  %s2725_s30 = scalar_lea.vmem %s2166_s29, 128  ;;  %p2730_p1 = scmp.lt.s32.totalorder %s2166_s29, %s2166_s29 }
   0xd   :  { %p2726_p0 = scmp.ne.s32.totalorder %s2166_s29, %s2725_s30  ;;  %p2731_p2 = scmp.lt.s32.totalorder %s2725_s30, %s2725_s30 }
   0xe   :  { %2694 = vset.pattern.permute.xlu0 %v2751_v25 }
   0xf   :  { %p2732_p3 = por %p2731_p2, %p2730_p1 }
  0x10   :  { %529 = vperm.xlu1 %2695, %v2806_v0  }
  0x11   :  { %p2733_p4 = pnand %p2732_p3, %p2726_p0 }
  0x14   :  { %532 = vperm.xlu1 %2695, %v2818_v3  }
  0x81   :  { %v80_v26 = vpop.permute.xlu1 %79  ;;  %v74_v27 = vpop.permute.xlu0 %73 }
  0x82   :  { %vm89_vm7 = vcmp.eq.s32.totalorder %v2855_v28, %v80_v26  ;;  %vm87_vm8 = vcmp.eq.s32.totalorder %v2855_v28, %v74_v27 }
  0x85   :  { %v83_v29 = vpop.permute.xlu1 %82  ;;  %v77_v30 = vpop.permute.xlu0 %76 }
  0x86   :  { %vm88_vm6 = vcmp.eq.s32.totalorder %v2855_v28, %v77_v30  ;;  %vm90_vm9 = vcmp.eq.s32.totalorder %v2855_v28, %v83_v29 }
  0x87   :  { %vm2576_vm10 = vmpackc.low %vm88_vm6, %vm87_vm8 }
  0x88   :  { %2577 = vmatprep.subr.msk.bf16.mxu0 %vm2576_vm10, %v2752_v31  ;;  %vm2580_vm11 = vmpackc.low %vm90_vm9, %vm89_vm7 }
  0x89   :  { %2579 = vmatpush3.bf16.msk.msra.mxu0 %vm2576_vm10, %v2752_v31  ;;  %v86_v32 = vpop.permute.xlu0 %85 }
  0x8a   :  { %2581 = vmatprep.subr.msk.bf16.mxu0 %vm2580_vm11, %v2752_v31  ;;  %vm91_vm12 = vcmp.eq.s32.totalorder %v2855_v28, %v86_v32 }
  0x8b   :  { %v527_v54 = vpop.permute.xlu1 %526 }
  0x8c   :  { %vm538_vm0 = vcmp.eq.s32.totalorder %v2855_v28, %v527_v54 }
  0x8d   :  { %2583 = vmatpush3.bf16.msk.msra.mxu0 %vm2580_vm11, %v2752_v31 }
  0x8e   :  { %2364 = vmatprep.subr.msk.mxu0 %vm91_vm12, %v2753_v33 }
  0x8f   :  { %v530_v55 = vpop.permute.xlu1 %529 }
  0x90   :  { %vm539_vm3 = vcmp.eq.s32.totalorder %v2855_v28, %v530_v55 }
  0x91   :  { %2365 = vmatpush3.msk.msra.mxu0 %vm91_vm12, %v2753_v33 }
  0x92   :  { %2367 = vmatmul.mubr.msk.f32.vlgmr.msra.gmra.mrb[0].mxu0 %vm97_vm4, %v48_v18  ;;  %2598 = vmatprep.subr.bf16.mxu0 %v2755_v47 }
  0x93   :  { %2369 = vmatprep.mubr.msk.f32.mxu0 %vm97_vm4, %v55_v34  ;;  %v533_v56 = vpop.permute.xlu1 %532 }
  0x94   :  { %vm540_vm5 = vcmp.eq.s32.totalorder %v2855_v28, %v533_v56 }
  0x95   :  { %vm2602_vm7 = vmpackc.low %vm540_vm5, %vm539_vm3 }
  0x96   :  { %2370 = vmatmul.mubr.msk.f32.gmra.mrb[2].mxu0 %vm97_vm4, %v56_v21 }
  0x97   :  { %2372 = vmatprep.mubr.msk.f32.mxu0 %vm97_vm4, %v63_v35 }
  0x9a   :  { %2373 = vmatmul.mubr.msk.f32.gmra.mrb[4].mxu0 %vm97_vm4, %v64_v24 }
  0x9b   :  { %2375 = vmatprep.mubr.msk.f32.mxu0 %vm97_vm4, %v39_v15 }
  0x9e   :  { %2376 = vmatmul.mubr.msk.f32.gmra.mrb[6].mxu0 %vm97_vm4, %v40_v16 }
  0x9f   :  { %2414 = vmatprep.mubr.msk.f32.mxu0 %vm2756_vm14, %v2750_v12 }
 0x165   :  { %v2875_v36 = vpop.f32.mrb[0].mxu0 }
 0x166   :  { %v2877_v37 = vpop.f32.mrb[1].mxu0  ;;  %v231_v48 = vsel %vm227_vm13, %v2875_v36, 0.0 }
 0x167   :  { %v228_v49 = vsel %vm227_vm13, %v2877_v37, 0.0 }
 0x169   :  { %v2879_v38 = vpop.f32.mrb[2].mxu0 }
 0x16a   :  { %v2881_v39 = vpop.f32.mrb[3].mxu0  ;;  %v237_v52 = vsel %vm227_vm13, %v2879_v38, 0.0 }
 0x16b   :  { %v234_v50 = vsel %vm227_vm13, %v2881_v39, 0.0 }
 0x16d   :  { %v2883_v40 = vpop.f32.mrb[4].mxu0 }
 0x16e   :  { %v2885_v41 = vpop.f32.mrb[5].mxu0  ;;  %v243_v14 = vsel %vm227_vm13, %v2883_v40, 0.0 }
 0x16f   :  { %v240_v53 = vsel %vm227_vm13, %v2885_v41, 0.0 }
 0x171   :  { %v2887_v42 = vpop.f32.mrb[6].mxu0 }
 0x172   :  { %v2889_v43 = vpop.f32.mrb[7].mxu0  ;;  %v267_v44 = vsel %vm227_vm13, %v2887_v42, 0.0 }
 0x173   :  { %268 = vadd.xlane.f32.xlu0 %v267_v44  ;;  %v264_v45 = vsel %vm227_vm13, %v2889_v43, 0.0 }
 0x174   :  { %265 = vadd.xlane.f32.xlu1 %v264_v45 }
 0x185   :  { %535 = vperm.xlu1 %2695, %v2830_v5  }
 0x189   :  { %523 = vperm.xlu0 %2694, %v2811_v1   ;;  %2697 = vset.pattern.permute.xlu1 %v2754_v46 }
 0x18d   :  { %2696 = vset.pattern.permute.xlu0 %v2754_v46 }
 0x1a8   :  { %232 = vadd.xlane.f32.xlu0 %v231_v48 }
 0x1a9   :  { %229 = vadd.xlane.f32.xlu1 %v228_v49 }
 0x1ad   :  { %235 = vadd.xlane.f32.xlu1 %v234_v50  ;;  %v2196_v50 = vld [vmem:[%s3284_s2 + $0x3] ss:$0 sm:$0xff] }
 0x1be   :  { %302 = vperm.xlu0 %2696, %v2818_v3   ;;  %293 = vperm.xlu1 %2697, %v2811_v1  }
 0x1c2   :  { %296 = vperm.xlu1 %2697, %v2823_v4   ;;  %2698 = vset.pattern.permute.xlu0 %v2757_v51 }
 0x1c6   :  { %299 = vperm.xlu1 %2697, %v2806_v0  }
 0x1ca   :  { %305 = vperm.xlu1 %2697, %v2830_v5  }
 0x1ce   :  { %2699 = vset.pattern.permute.xlu1 %v2757_v51 }
 0x1dd   :  { %238 = vadd.xlane.f32.xlu0 %v237_v52 }
 0x1ee   :  { %241 = vadd.xlane.f32.xlu1 %v240_v53 }
 0x1f3   :  { %412 = vperm.xlu0 %2698, %v2811_v1   ;;  %v291_v1 = vmul.f32 %v2188_v62, %v2926_v63 }
 0x1f5   :  { %2388 = vmatprep.mubr.msk.f32.mxu1 %vm97_vm4, %v291_v1 }
 0x1f7   :  { %2700 = vset.pattern.permute.xlu0 %v2751_v25 }
 0x1ff   :  { %415 = vperm.xlu1 %2699, %v2823_v4  }
 0x200   :  { %v269_v57 = vpop.xlane.xlu0 %268 }
 0x201   :  { %v273_v59 = vmax.f32 %v269_v57, 1.0  ;;  %v266_v60 = vpop.xlane.xlu1 %265  ;;  %vm271_vm6 = vcmp.gt.f32.partialorder %v269_v57, 0.0 }
 0x202   :  { %v272_v61 = vmax.f32 %v266_v60, 1.0  ;;  %vm270_vm8 = vcmp.gt.f32.partialorder %v266_v60, 0.0 }
 0x203   :  { %2701 = vrsqrt.f32 %v273_v59  ;;  %418 = vperm.xlu1 %2699, %v2806_v0   ;;  %v2203_v0 = vld [vmem:[%s3284_s2 + $0x4] ss:$0 sm:$0xff]  ;;  %s2758_s2 = smov 5  }
 0x204   :  { %2703 = vrsqrt.f32 %v272_v61  ;;  %vm520_vm9 = vcmp.eq.s32.totalorder %v2833_v7, %v2203_v0 }
 0x205   :  { %v536_v10 = vpop.permute.xlu1 %535  ;;  %v521_v15 = vsel %vm520_vm9, 1.0, %v2750_v12 }
 0x206   :  { %vm541_vm10 = vcmp.eq.s32.totalorder %v2855_v28, %v536_v10 }
 0x207   :  { %421 = vperm.xlu1 %2699, %v2818_v3   ;;  %v2945_v3 = vld [vmem:[%s3282_s0 + $0x8] sm:$0xff] }
 0x208   :  { %v524_v2 = vpop.permute.xlu0 %523  ;;  %v2604_v53 = vpack.c.bf16 %v2945_v3, %v2950_v6 }
 0x209   :  { %vm537_vm1 = vcmp.eq.s32.totalorder %v2855_v28, %v524_v2 }
 0x20a   :  { %vm2599_vm2 = vmpackc.low %vm538_vm0, %vm537_vm1 }
 0x20b   :  { %2600 = vmatpush3.bf16.msk.msra.mxu0 %vm2599_vm2, %v2752_v31  ;;  %424 = vperm.xlu1 %2699, %v2830_v5  }
 0x20c   :  { %2601 = vmatprep.subr.bf16.mxu0 %v2755_v47 }
 0x20d   :  { %v2702_v4 = vpop.eup %2701 }
 0x20e   :  { %v2704_v8 = vpop.eup %2703  ;;  %v2952_v5 = vsel %vm271_vm6, %v2702_v4, 0.0 }
 0x20f   :  { %v2955_v9 = vsel %vm270_vm8, %v2704_v8, 0.0  ;;  %2603 = vmatpush3.bf16.msk.msra.mxu0 %vm2602_vm7, %v2752_v31  ;;  %v744_v11 = vmul.f32 %v2952_v5, %v2945_v3 }
 0x210   :  { %2412 = vmatprep.subr.mxu0 %v2750_v12  ;;  %v743_v13 = vmul.f32 %v2955_v9, %v2950_v6 }
 0x212   :  { %244 = vadd.xlane.f32.xlu0 %v243_v14  ;;  %v2608_v16 = vpack.c.bf16 %v744_v11, %v743_v13 }
 0x213   :  { %2413 = vmatpush3.msk.msra.mxu0 %vm541_vm10, %v2753_v33 }
 0x214   :  { %2415 = vmatmul.mubr.msk.f32.vlgmr.msra.gmra.mrb[8].mxu0 %vm97_vm4, %v521_v15  ;;  %2609 = vmatprep.subr.bf16.mxu0 %v2608_v16 }
 0x215   :  { %2611 = vmatpush3.bf16.msra.mxu0 %v2608_v16  ;;  %2434 = vmatprep.mubr.msk.f32.mxu0 %vm227_vm13, %v2889_v43 }
 0x218   :  { %2435 = vmatmul.mubr.msk.f32.vlgmr.msra.gmra.mrb[10].mxu0 %vm227_vm13, %v2887_v42 }
 0x219   :  { %2441 = vmatprep.mubr.msk.f32.mxu0 %vm227_vm13, %v2889_v43 }
 0x235   :  { %v233_v17 = vpop.xlane.xlu0 %232 }
 0x236   :  { %v247_v18 = vmax.f32 %v233_v17, 1.0  ;;  %v230_v19 = vpop.xlane.xlu1 %229 }
 0x237   :  { %v246_v20 = vmax.f32 %v230_v19, 1.0 }
 0x238   :  { %2705 = vrcp.f32 %v247_v18 }
 0x239   :  { %2707 = vrcp.f32 %v246_v20 }
 0x23a   :  { %v236_v21 = vpop.xlane.xlu1 %235 }
 0x23b   :  { %v248_v22 = vmax.f32 %v236_v21, 1.0 }
 0x23d   :  { %2709 = vrcp.f32 %v248_v22  ;;  %v303_v29 = vpop.permute.xlu0 %302 }
 0x23e   :  { %v294_v23 = vpop.permute.xlu1 %293  ;;  %vm310_vm0 = vcmp.eq.s32.totalorder %v2855_v28, %v303_v29  ;;  %v1056_v29 = vld [vmem:[%s3287_s5 + $0x20] sm:$0x7] }
 0x23f   :  { %vm307_vm11 = vcmp.eq.s32.totalorder %v2855_v28, %v294_v23  ;;  %v1052_v23 = vld [vmem:[%s3287_s5] sm:$0xff] }
 0x242   :  { %v2706_v24 = vpop.eup %2705  ;;  %v297_v25 = vpop.permute.xlu1 %296 }
 0x243   :  { %v2708_v26 = vpop.eup %2707  ;;  %vm308_vm12 = vcmp.eq.s32.totalorder %v2855_v28, %v297_v25  ;;  %v255_v27 = vmul.f32 %v2706_v24, %v2875_v36  ;;  %v1053_v24 = vld [vmem:[%s3287_s5 + $0x8] sm:$0xff]  ;;  %v1054_v25 = vld [vmem:[%s3287_s5 + $0x10] sm:$0xff] }
 0x244   :  { %vm2584_vm15 = vmpackc.low %vm308_vm12, %vm307_vm11  ;;  %v253_v30 = vmul.f32 %v2708_v26, %v2877_v37  ;;  %vm409_vm11 = vcmp.eq.s32.totalorder %v2833_v7, %v2196_v50  ;;  %v2620_v26 = vpack.c.bf16 %v1053_v24, %v1052_v23 }
 0x245   :  { %2585 = vmatprep.subr.msk.bf16.mxu1 %vm2584_vm15, %v2752_v31  ;;  %v410_v54 = vsel %vm409_vm11, 1.0, %v2750_v12 }
 0x246   :  { %v300_v32 = vpop.permute.xlu1 %299  ;;  %2587 = vmatpush3.bf16.msk.msra.mxu1 %vm2584_vm15, %v2752_v31  ;;  %vm1034_vm15 = vcmask 39936  }
 0x247   :  { %v2710_v34 = vpop.eup %2709  ;;  %vm309_vm1 = vcmp.eq.s32.totalorder %v2855_v28, %v300_v32 }
 0x248   :  { %vm2588_vm2 = vmpackc.low %vm310_vm0, %vm309_vm1  ;;  %v257_v35 = vmul.f32 %v2710_v34, %v2881_v39  ;;  %vm1037_vm0 = vcmask 80896   ;;  %vm1040_vm1 = vcmask 121856  }
 0x249   :  { %2589 = vmatprep.subr.msk.bf16.mxu1 %vm2588_vm2, %v2752_v31 }
 0x24a   :  { %v306_v36 = vpop.permute.xlu1 %305  ;;  %2591 = vmatpush3.bf16.msk.msra.mxu1 %vm2588_vm2, %v2752_v31  ;;  %vm1043_vm2 = vcmask 162816  }
 0x24b   :  { %vm311_vm3 = vcmp.eq.s32.totalorder %v2855_v28, %v306_v36  ;;  %v26_v36 = vld [vmem:[%s3283_s1] sm:$0xff] }
 0x24c   :  { %2386 = vmatprep.subr.msk.mxu1 %vm311_vm3, %v2753_v33 }
 0x24e   :  { %2387 = vmatpush3.msk.msra.mxu1 %vm311_vm3, %v2753_v33  ;;  %vm1046_vm3 = vcmask 203776  }
 0x24f   :  { %2592 = vmatprep.subr.bf16.mxu1 %v2755_v47  ;;  %2389 = vmatmul.mubr.msk.f32.vlgmr.msra.gmra.mrb[0].mxu1 %vm97_vm4, %v2926_v63 }
 0x250   :  { %2401 = vmatprep.mubr.msk.f32.mxu1 %vm2756_vm14, %v2750_v12 }
 0x26a   :  { %v239_v37 = vpop.xlane.xlu0 %238 }
 0x26b   :  { %v249_v48 = vmax.f32 %v239_v37, 1.0 }
 0x26d   :  { %2711 = vrcp.f32 %v249_v48 }
 0x272   :  { %v413_v44 = vpop.permute.xlu0 %412 }
 0x273   :  { %vm426_vm5 = vcmp.eq.s32.totalorder %v2855_v28, %v413_v44 }
 0x277   :  { %v2712_v7 = vpop.eup %2711 }
 0x278   :  { %v259_v55 = vmul.f32 %v2712_v7, %v2879_v38 }
 0x27b   :  { %v242_v39 = vpop.xlane.xlu1 %241 }
 0x27c   :  { %v250_v49 = vmax.f32 %v242_v39, 1.0 }
 0x27e   :  { %2713 = vrcp.f32 %v250_v49 }
 0x27f   :  { %v416_v45 = vpop.permute.xlu1 %415 }
 0x280   :  { %vm427_vm6 = vcmp.eq.s32.totalorder %v2855_v28, %v416_v45 }
 0x281   :  { %vm2593_vm7 = vmpackc.low %vm427_vm6, %vm426_vm5  ;;  %vm1049_vm5 = vcmask 244736   ;;  %vm1062_vm6 = vcmask 285696  }
 0x282   :  { %2594 = vmatpush3.bf16.msk.msra.mxu1 %vm2593_vm7, %v2752_v31  ;;  %vm1254_vm7 = vcmask 1045504  }
 0x283   :  { %v419_v46 = vpop.permute.xlu1 %418  ;;  %2595 = vmatprep.subr.bf16.mxu1 %v2755_v47 }
 0x284   :  { %vm428_vm8 = vcmp.eq.s32.totalorder %v2855_v28, %v419_v46 }
 0x287   :  { %v422_v51 = vpop.permute.xlu1 %421 }
 0x288   :  { %vm429_vm9 = vcmp.eq.s32.totalorder %v2855_v28, %v422_v51 }
 0x289   :  { %vm2596_vm10 = vmpackc.low %vm429_vm9, %vm428_vm8  ;;  %vm1250_vm8 = vcmask 179200   ;;  %vm1343_vm9 = vcmask 261120  }
 0x28a   :  { %2597 = vmatpush3.bf16.msk.msra.mxu1 %vm2596_vm10, %v2752_v31  ;;  %v2714_v31 = vpop.eup %2713  ;;  %vm620_vm10 = vcmask 64512  }
 0x28b   :  { %v425_v52 = vpop.permute.xlu1 %424  ;;  %2399 = vmatprep.subr.mxu1 %v2750_v12 }
 0x28c   :  { %vm430_vm12 = vcmp.eq.s32.totalorder %v2855_v28, %v425_v52  ;;  %v261_v28 = vmul.f32 %v2714_v31, %v2885_v41 }
 0x28e   :  { %2400 = vmatpush3.msk.msra.mxu1 %vm430_vm12, %v2753_v33  ;;  %vm1827_vm12 = vcmask 392192  }
 0x28f   :  { %2402 = vmatmul.mubr.msk.f32.vlgmr.msra.gmra.mrb[2].mxu1 %vm97_vm4, %v410_v54  ;;  %2605 = vmatprep.subr.bf16.mxu1 %v2604_v53  ;;  %vm1069_vm4 = vcmask 1042432  }
 0x290   :  { %2607 = vmatpush3.bf16.msra.mxu1 %v2604_v53  ;;  %2421 = vmatprep.mubr.msk.f32.mxu1 %vm227_vm13, %v253_v30 }
 0x293   :  { %2422 = vmatmul.mubr.msk.f32.vlgmr.msra.gmra.mrb[4].mxu1 %vm227_vm13, %v255_v27 }
 0x294   :  { %2424 = vmatprep.mubr.msk.f32.mxu1 %vm227_vm13, %v257_v35 }
 0x297   :  { %2425 = vmatmul.mubr.msk.f32.gmra.mrb[6].mxu1 %vm227_vm13, %v259_v55 }
 0x298   :  { %2427 = vmatprep.mubr.msk.f32.mxu1 %vm227_vm13, %v261_v28 }
 0x29f   :  { %v245_v33 = vpop.xlane.xlu0 %244 }
 0x2a0   :  { %v251_v56 = vmax.f32 %v245_v33, 1.0 }
 0x2a2   :  { %2715 = vrcp.f32 %v251_v56 }
 0x2ac   :  { %v2716_v57 = vpop.eup %2715 }
 0x2ad   :  { %v263_v58 = vmul.f32 %v2716_v57, %v2883_v40 }
 0x2af   :  { %2428 = vmatmul.mubr.msk.f32.gmra.mrb[8].mxu1 %vm227_vm13, %v263_v58 }
 0x2b0   :  { %2448 = vmatprep.mubr.msk.f32.mxu1 %vm227_vm13, %v2889_v43 }
 0x2e7   :  { %v3023_v59 = vpop.f32.mrb[8].mxu0 }
 0x2e8   :  { %v2416_v38 = vpop.f32.mrb[9].mxu0 }
 0x2eb   :  { %v2436_v60 = vpop.f32.mrb[10].mxu0 }
 0x2ec   :  { %v827_v41 = vmul.f32 %v2436_v60, %v2952_v5  ;;  %v817_v61 = vpop.f32.mrb[11].mxu0 }
 0x2ed   :  { %v826_v62 = vmul.f32 %v817_v61, %v2955_v9 }
 0x2ee   :  { %v829_v63 = vmul.f32 %v827_v41, %v2952_v5 }
 0x2ef   :  { %v828_v1 = vmul.f32 %v826_v62, %v2955_v9 }
 0x2f1   :  { %v2612_v2 = vpack.c.bf16 %v829_v63, %v828_v1 }
 0x2f3   :  { %2613 = vmatprep.subr.bf16.mxu0 %v2612_v2 }
 0x2f4   :  { %2615 = vmatpush3.bf16.msra.mxu0 %v2612_v2 }
 0x2f5   :  { %2621 = vmatprep.subr.bf16.mxu0 %v2620_v26 }
 0x2f7   :  { %2442 = vmatmul.mubr.msk.f32.vlgmr.msra.gmra.mrb[12].mxu0 %vm227_vm13, %v2887_v42 }
 0x2f8   :  { %2623 = vmatpush3.bf16.msra.mxu0 %v2620_v26  ;;  %v1334_v26 = vld [vmem:[%s3287_s5 + $0x40] sm:$0xff] }
 0x322   :  { %v3031_v40 = vpop.f32.mrb[0].mxu1 }
 0x323   :  { %v3033_v43 = vpop.f32.mrb[1].mxu1  ;;  %v398_v37 = vsel %vm227_vm13, %v3031_v40, 0.0 }
 0x362   :  { %v3035_v0 = vpop.f32.mrb[2].mxu1 }
 0x363   :  { %v2403_v4 = vpop.f32.mrb[3].mxu1 }
 0x366   :  { %v2423_v8 = vpop.f32.mrb[4].mxu1 }
 0x367   :  { %990 = vrot.lane.b32.xlu1 %v2423_v8, %s2758_s2  ;;  %v714_v10 = vpop.f32.mrb[5].mxu1 }
 0x36a   :  { %v2426_v11 = vpop.f32.mrb[6].mxu1 }
 0x36b   :  { %988 = vrot.lane.b32.xlu1 %v714_v10, %s2758_s2  ;;  %v724_v13 = vpop.f32.mrb[7].mxu1  ;;  %v2222_v10 = vld [vmem:[%s3287_s5 + $0x110] ss:$0 sm:$0xff] }
 0x36f   :  { %998 = vrot.lane.b32.xlu1 %v2426_v11, %s2759_s20 }
 0x373   :  { %996 = vrot.lane.b32.xlu1 %v724_v13, %s2759_s20 }
 0x382   :  { %v2429_v14 = vpop.f32.mrb[8].mxu1 }
 0x383   :  { %1006 = vrot.lane.b32.xlu1 %v2429_v14, %s2760_s21  ;;  %v734_v15 = vpop.f32.mrb[9].mxu1 }
 0x384   :  { %1004 = vrot.lane.b32.xlu0 %v734_v15, %s2760_s21  ;;  %s2765_s21 = smov 32  }
 0x387   :  { %1014 = vrot.lane.b32.xlu1 %v827_v41, %s2761_s22 }
 0x38b   :  { %1012 = vrot.lane.b32.xlu1 %v826_v62, %s2761_s22 }
 0x3ca   :  { %v2443_v16 = vpop.f32.mrb[12].mxu0 }
 0x3cb   :  { %v906_v17 = vmul.f32 %v2443_v16, %v2952_v5  ;;  %v896_v18 = vpop.f32.mrb[13].mxu0 }
 0x3cc   :  { %v905_v19 = vmul.f32 %v896_v18, %v2955_v9 }
 0x3cd   :  { %v908_v20 = vmul.f32 %v906_v17, %v2952_v5  ;;  %1022 = vrot.lane.b32.xlu1 %v906_v17, %s2762_s23 }
 0x3ce   :  { %v907_v21 = vmul.f32 %v905_v19, %v2955_v9 }
 0x3d0   :  { %v2616_v22 = vpack.c.bf16 %v908_v20, %v907_v21 }
 0x3d1   :  { %1020 = vrot.lane.b32.xlu1 %v905_v19, %s2762_s23 }
 0x3d2   :  { %2617 = vmatprep.subr.bf16.mxu1 %v2616_v22 }
 0x3d3   :  { %2619 = vmatpush3.bf16.msra.mxu1 %v2616_v22 }
 0x3d4   :  { %2628 = vmatprep.subr.bf16.mxu1 %v2755_v47 }
 0x3d6   :  { %2449 = vmatmul.mubr.msk.f32.vlgmr.msra.gmra.mrb[10].mxu1 %vm227_vm13, %v2887_v42  ;;  %v1055_v42 = vld [vmem:[%s3287_s5 + $0x18] sm:$0xff] }
 0x3d7   :  { %2468 = vmatprep.mubr.msk.f32.mxu1 %vm2756_vm14, %v2750_v12  ;;  %v2624_v27 = vpack.c.bf16 %v1055_v42, %v1054_v25  ;;  %v1335_v42 = vld [vmem:[%s3287_s5 + $0x48] sm:$0xff] }
 0x3d9   :  { %2625 = vmatprep.subr.bf16.mxu0 %v2624_v27  ;;  %v991_v39 = vpop.permute.xlu1 %990 }
 0x3da   :  { %2627 = vmatpush3.bf16.msra.mxu0 %v2624_v27  ;;  %v1036_v54 = vsel %vm1034_vm15, %v2945_v3, %v991_v39  ;;  %v1242_v3 = vld [vmem:[%s3287_s5 + $0x28] sm:$0xff]  ;;  %v1336_v27 = vld [vmem:[%s3287_s5 + $0x50] sm:$0xff] }
 0x3db   :  { %2459 = vmatprep.subr.msk.mxu0 %vm1069_vm4, %v1056_v29 }
 0x3de   :  { %2460 = vmatpush3.msk.msra.mxu0 %vm1069_vm4, %v1056_v29  ;;  %v2635_v29 = vpack.c.bf16 %v1335_v42, %v1334_v26  ;;  %v1830_v26 = vld [vmem:[%s3287_s5 + $0xa8] sm:$0xff]  ;;  %v1831_v42 = vld [vmem:[%s3287_s5 + $0xb0] sm:$0xff]  ;;  %vm1842_vm4 = vcmask 523264  }
 0x3df   :  { %2631 = vmatprep.subr.bf16.mxu0 %v2755_v47 }
 0x3f6   :  { %v1005_v51 = vpop.permute.xlu0 %1004 }
 0x4a9   :  { %v2450_v30 = vpop.f32.mrb[10].mxu1 }
 0x4aa   :  { %v985_v32 = vmul.f32 %v2450_v30, %v2952_v5  ;;  %v975_v34 = vpop.f32.mrb[11].mxu1  ;;  %v509_v5 = vsel %vm227_vm13, %v3035_v0, 0.0  ;;  %v1337_v30 = vld [vmem:[%s3287_s5 + $0x58] sm:$0xff] }
 0x4ab   :  { %v984_v35 = vmul.f32 %v975_v34, %v2955_v9  ;;  %v989_v9 = vpop.permute.xlu1 %988  ;;  %v2229_v34 = vld [vmem:[%s3287_s5 + $0x111] ss:$0 sm:$0xff] }
 0x4ac   :  { %1030 = vrot.lane.b32.xlu0 %v985_v32, %s2763_s10  ;;  %v1035_v52 = vsel %vm1034_vm15, %v2950_v6, %v989_v9  ;;  %v1243_v6 = vld [vmem:[%s3287_s5 + $0x30] sm:$0xff]  ;;  %v2638_v32 = vpack.c.bf16 %v1337_v30, %v1336_v27  ;;  %v1833_v30 = vld [vmem:[%s3287_s5 + $0xc0] sm:$0xff] }
 0x4ad   :  { %1028 = vrot.lane.b32.xlu1 %v984_v35, %s2763_s10  ;;  %v2632_v62 = vpack.c.bf16 %v1243_v6, %v1242_v3  ;;  %v1514_v3 = vld [vmem:[%s3287_s5 + $0x98] sm:$0xff] }
 0x4af   :  { %v999_v44 = vpop.permute.xlu1 %998 }
 0x4b0   :  { %v1039_v31 = vsel %vm1037_vm0, %v1036_v54, %v999_v44  ;;  %v1423_v44 = vld [vmem:[%s3287_s5 + $0x60] sm:$0xff] }
 0x4b1   :  { %1238 = vrot.lane.b32.xlu1 %v26_v36, %s2764_s12 }
 0x4b3   :  { %v997_v45 = vpop.permute.xlu1 %996 }
 0x4b4   :  { %v1038_v7 = vsel %vm1037_vm0, %v1035_v52, %v997_v45  ;;  %v1424_v45 = vld [vmem:[%s3287_s5 + $0x68] sm:$0xff] }
 0x4b5   :  { %v1041_v55 = vsel %vm1040_vm1, %v1038_v7, %v1005_v51  ;;  %v2232_v51 = vld [vmem:[%s3287_s5 + $0x112] ss:$0 sm:$0xff] }
 0x4b7   :  { %v1007_v46 = vpop.permute.xlu1 %1006 }
 0x4b8   :  { %v1042_v28 = vsel %vm1040_vm1, %v1039_v31, %v1007_v46  ;;  %v1425_v46 = vld [vmem:[%s3287_s5 + $0x70] sm:$0xff]  ;;  %v621_v31 = vsel %vm620_vm10, %v3023_v59, 0.0 }
 0x4bb   :  { %v1015_v48 = vpop.permute.xlu1 %1014 }
 0x4bc   :  { %v1045_v57 = vsel %vm1043_vm2, %v1042_v28, %v1015_v48  ;;  %v2641_v48 = vpack.c.bf16 %v1424_v45, %v1423_v44 }
 0x4bf   :  { %v1013_v49 = vpop.permute.xlu1 %1012 }
 0x4c0   :  { %v1044_v33 = vsel %vm1043_vm2, %v1041_v55, %v1013_v49  ;;  %v1426_v49 = vld [vmem:[%s3287_s5 + $0x78] sm:$0xff] }
 0x4c3   :  { %v1023_v50 = vpop.permute.xlu1 %1022 }
 0x4c4   :  { %v1048_v60 = vsel %vm1046_vm3, %v1045_v57, %v1023_v50  ;;  %v2644_v50 = vpack.c.bf16 %v1426_v49, %v1425_v46 }
 0x4c7   :  { %v1021_v53 = vpop.permute.xlu1 %1020 }
 0x4c8   :  { %v1047_v58 = vsel %vm1046_vm3, %v1044_v33, %v1021_v53 }
 0x4cb   :  { %399 = vadd.xlane.f32.xlu0 %v398_v37 }
 0x4d5   :  { %510 = vadd.xlane.f32.xlu1 %v509_v5 }
 0x51e   :  { %v1031_v56 = vpop.permute.xlu0 %1030 }
 0x51f   :  { %v1029_v38 = vpop.permute.xlu1 %1028  ;;  %v1051_v61 = vsel %vm1049_vm5, %v1048_v60, %v1031_v56  ;;  %v1512_v60 = vld [vmem:[%s3287_s5 + $0x88] sm:$0xff] }
 0x520   :  { %v1050_v41 = vsel %vm1049_vm5, %v1047_v58, %v1029_v38  ;;  %v1511_v38 = vld [vmem:[%s3287_s5 + $0x80] sm:$0xff] }
 0x521   :  { %2461 = vmatprep.mubr.msk.f32.mxu0 %vm1062_vm6, %v1050_v41  ;;  %v1513_v41 = vld [vmem:[%s3287_s5 + $0x90] sm:$0xff] }
 0x522   :  { %2462 = vmatmul.mubr.msk.f32.vlgmr.msra.gmra.mrb[14].mxu0 %vm1062_vm6, %v1051_v61  ;;  %v2647_v61 = vpack.c.bf16 %v1512_v60, %v1511_v38  ;;  %v2650_v6 = vpack.c.bf16 %v1514_v3, %v1513_v41  ;;  %v2079_v3 = vld [vmem:[%s3287_s5 + $0x108] sm:$0xff] }
 0x523   :  { %2483 = vmatprep.mubr.msk.f32.mxu0 %vm2756_vm14, %v2750_v12  ;;  %2633 = vmatpush3.bf16.msra.mxu0 %v2632_v62  ;;  %v1239_v63 = vpop.permute.xlu1 %1238  ;;  %v2234_v62 = vld [vmem:[%s3287_s5 + $0x113] ss:$0 sm:$0xff] }
 0x524   :  { %2481 = vmatprep.subr.mxu0 %v2750_v12 }
 0x558   :  { %v400_v1 = vpop.xlane.xlu0 %399 }
 0x559   :  { %v401_v2 = vmax.f32 %v400_v1, 1.0 }
 0x55b   :  { %2717 = vrcp.f32 %v401_v2 }
 0x562   :  { %v511_v4 = vpop.xlane.xlu1 %510 }
 0x563   :  { %v512_v8 = vmax.f32 %v511_v4, 1.0 }
 0x565   :  { %2719 = vrcp.f32 %v512_v8  ;;  %v2718_v17 = vpop.eup %2717 }
 0x566   :  { %v403_v18 = vmul.f32 %v2718_v17, %v3031_v40 }
 0x56f   :  { %v2720_v19 = vpop.eup %2719 }
 0x570   :  { %v514_v20 = vmul.f32 %v2720_v19, %v3035_v0 }
 0x5f5   :  { %v2463_v11 = vpop.f32.mrb[14].mxu0 }
 0x5f6   :  { %v1145_v13 = vadd.f32 %v2463_v11, %v2222_v10  ;;  %v1139_v14 = vpop.f32.mrb[15].mxu0  ;;  %v2236_v11 = vld [vmem:[%s3287_s5 + $0x114] ss:$0 sm:$0xff] }
 0x5f7   :  { %v1140_v15 = vadd.f32 %v2222_v10, %v1139_v14 }
 0x5f9   :  { %v2629_v16 = vpack.c.bf16 %v1145_v13, %v1140_v15 }
 0x5fb   :  { %2630 = vmatpush3.bf16.msra.mxu1 %v2629_v16 }
 0x5fc   :  { %2634 = vmatprep.subr.bf16.mxu1 %v2755_v47 }
 0x5fe   :  { %2469 = vmatmul.mubr.msk.f32.vlgmr.msra.gmra.mrb[12].mxu1 %vm227_vm13, %v3033_v43  ;;  %v1244_v43 = vld [vmem:[%s3287_s5 + $0x38] sm:$0x3f] }
 0x5ff   :  { %2471 = vmatprep.mubr.msk.f32.mxu1 %vm2756_vm14, %v2750_v12  ;;  %2482 = vmatpush3.msk.msra.mxu0 %vm1254_vm7, %v1244_v43 }
 0x600   :  { %2640 = vmatprep.subr.bf16.mxu0 %v2755_v47  ;;  %2636 = vmatpush3.bf16.msra.mxu1 %v2635_v29 }
 0x601   :  { %2637 = vmatprep.subr.bf16.mxu1 %v2755_v47 }
 0x602   :  { %2472 = vmatmul.mubr.msk.f32.gmra.mrb[14].mxu1 %vm227_vm13, %v403_v18 }
 0x603   :  { %2474 = vmatprep.mubr.msk.f32.mxu1 %vm2756_vm14, %v2750_v12 }
 0x604   :  { %2639 = vmatpush3.bf16.msra.mxu1 %v2638_v32  ;;  %v1834_v32 = vld [vmem:[%s3287_s5 + $0xc8] sm:$0xff] }
 0x605   :  { %2646 = vmatprep.subr.bf16.mxu1 %v2755_v47 }
 0x606   :  { %2475 = vmatmul.mubr.msk.f32.gmra.mrb[16].mxu1 %vm227_vm13, %v514_v20 }
 0x607   :  { %2494 = vmatprep.mubr.msk.f32.mxu1 %vm2756_vm14, %v2750_v12 }
 0x6d1   :  { %v1223_v40 = vpop.f32.mrb[12].mxu1 }
 0x6d2   :  { %v1241_v21 = vsel %vm227_vm13, %v1223_v40, %v1239_v63  ;;  %v2470_v22 = vpop.f32.mrb[13].mxu1 }
 0x6d3   :  { %2484 = vmatmul.mubr.msk.f32.vlgmr.msra.gmra.mrb[16].mxu0 %vm1250_vm8, %v1241_v21 }
 0x6d4   :  { %2505 = vmatprep.mubr.msk.f32.mxu0 %vm2756_vm14, %v2750_v12  ;;  %2642 = vmatpush3.bf16.msra.mxu0 %v2641_v48 }
 0x6d5   :  { %v1228_v0 = vpop.f32.mrb[14].mxu1  ;;  %2643 = vmatprep.subr.bf16.mxu0 %v2755_v47 }
 0x6d6   :  { %v2473_v23 = vpop.f32.mrb[15].mxu1 }
 0x6d8   :  { %2645 = vmatpush3.bf16.msra.mxu0 %v2644_v50 }
 0x6d9   :  { %v3106_v24 = vpop.f32.mrb[16].mxu1  ;;  %2519 = vmatprep.subr.mxu0 %v2750_v12 }
 0x6da   :  { %v2476_v25 = vpop.f32.mrb[17].mxu1 }
 0x6db   :  { %v1829_v25 = vld [vmem:[%s3287_s5 + $0xa0] sm:$0xff] }
 0x6dc   :  { %v2653_v27 = vpack.c.bf16 %v1830_v26, %v1829_v25 }
 0x7a6   :  { %v1324_v35 = vpop.f32.mrb[16].mxu0 }
 0x7a7   :  { %v1325_v36 = vadd.f32 %v2229_v34, %v1324_v35  ;;  %v2485_v37 = vpop.f32.mrb[17].mxu0  ;;  %v2659_v34 = vpack.c.bf16 %v1834_v32, %v1833_v30  ;;  %v1835_v35 = vld [vmem:[%s3287_s5 + $0xd0] sm:$0xff] }
 0x7a9   :  { %v1328_v5 = vmax.f32 %v1325_v36, 0.0  ;;  %v1836_v36 = vld [vmem:[%s3287_s5 + $0xd8] sm:$0xff] }
 0x7aa   :  { %v2662_v37 = vpack.c.bf16 %v1836_v36, %v1835_v35 }
 0x7ab   :  { %1330 = vrot.lane.b32.xlu0 %v1328_v5, %s2764_s12 }
 0x81d   :  { %v1331_v39 = vpop.permute.xlu0 %1330 }
 0x81e   :  { %v1333_v9 = vsel %vm227_vm13, %v1228_v0, %v1331_v39 }
 0x81f   :  { %2495 = vmatmul.mubr.msk.f32.vlgmr.msra.gmra.mrb[18].mxu1 %vm1343_vm9, %v1333_v9 }
 0x820   :  { %2516 = vmatprep.mubr.msk.f32.mxu1 %vm2756_vm14, %v2750_v12  ;;  %2648 = vmatpush3.bf16.msra.mxu1 %v2647_v61 }
 0x821   :  { %2649 = vmatprep.subr.bf16.mxu1 %v2755_v47 }
 0x824   :  { %2651 = vmatpush3.bf16.msra.mxu1 %v2650_v6 }
 0x825   :  { %2524 = vmatprep.subr.mxu1 %v2750_v12 }
 0x8f2   :  { %v1413_v52 = vpop.f32.mrb[18].mxu1 }
 0x8f3   :  { %v1414_v53 = vadd.f32 %v2232_v51, %v1413_v52  ;;  %v2496_v54 = vpop.f32.mrb[19].mxu1  ;;  %v2241_v51 = vld [vmem:[%s3287_s5 + $0x115] ss:$0 sm:$0xff] }
 0x8f4   :  { %v1996_v54 = vld [vmem:[%s3287_s5 + $0xe8] sm:$0xff] }
 0x8f5   :  { %v1417_v7 = vmax.f32 %v1414_v53, 0.0  ;;  %v1995_v53 = vld [vmem:[%s3287_s5 + $0xe0] sm:$0xff] }
 0x8f7   :  { %1419 = vrot.lane.b32.xlu1 %v1417_v7, %s2764_s12 }
 0x91b   :  { %622 = vadd.xlane.f32.xlu1 %v621_v31 }
 0x969   :  { %v1420_v55 = vpop.permute.xlu1 %1419 }
 0x96a   :  { %v1422_v28 = vsel %vm227_vm13, %v3106_v24, %v1420_v55 }
 0x96b   :  { %2506 = vmatmul.mubr.msk.f32.vlgmr.msra.gmra.mrb[18].mxu0 %vm1343_vm9, %v1422_v28  ;;  %v2665_v28 = vpack.c.bf16 %v1996_v54, %v1995_v53 }
 0x96c   :  { %2521 = vmatprep.mubr.msk.f32.mxu0 %vm2756_vm14, %v2750_v12 }
 0x9a8   :  { %v623_v33 = vpop.xlane.xlu1 %622 }
 0x9a9   :  { %v624_v56 = vmax.f32 %v623_v33, 1.0  ;;  %vm627_vm11 = vcmp.gt.f32.partialorder %v623_v33, 0.0  ;;  %v1997_v33 = vld [vmem:[%s3287_s5 + $0xf0] sm:$0xff] }
 0x9ab   :  { %2721 = vrcp.f32 %v624_v56 }
 0x9ac   :  { %2723 = vrsqrt.f32 %v624_v56  ;;  %v1998_v56 = vld [vmem:[%s3287_s5 + $0xf8] sm:$0xff] }
 0x9b5   :  { %v2722_v57 = vpop.eup %2721 }
 0x9b6   :  { %v3156_v58 = vmul.f32 %v2722_v57, %v3023_v59  ;;  %v2724_v14 = vpop.eup %2723  ;;  %v2668_v57 = vpack.c.bf16 %v1998_v56, %v1997_v33 }
 0x9b7   :  { %v629_v18 = vsel %vm627_vm11, %v2724_v14, 0.0 }
 0xa3e   :  { %v1501_v63 = vpop.f32.mrb[18].mxu0 }
 0xa3f   :  { %v1502_v1 = vadd.f32 %v2234_v62, %v1501_v63  ;;  %v2507_v2 = vpop.f32.mrb[19].mxu0 }
 0xa41   :  { %v1505_v4 = vmax.f32 %v1502_v1, 0.0 }
 0xa43   :  { %1507 = vrot.lane.b32.xlu0 %v1505_v4, %s2764_s12 }
 0xab5   :  { %v1508_v8 = vpop.permute.xlu0 %1507 }
 0xab6   :  { %v1510_v10 = vsel %vm227_vm13, %v3106_v24, %v1508_v8 }
 0xab7   :  { %2517 = vmatmul.mubr.msk.f32.vlgmr.msra.gmra.mrb[20].mxu1 %vm1343_vm9, %v1510_v10 }
 0xab8   :  { %2526 = vmatprep.mubr.msk.f32.mxu1 %vm2756_vm14, %v2750_v12 }
 0xb8a   :  { %v1589_v13 = vpop.f32.mrb[20].mxu1 }
 0xb8b   :  { %v1590_v15 = vadd.f32 %v2236_v11, %v1589_v13  ;;  %v2518_v16 = vpop.f32.mrb[21].mxu1 }
 0xb8d   :  { %v1593_v17 = vmax.f32 %v1590_v15, 0.0 }
 0xb8f   :  { %v1594_v19 = vmul.f32 %v1593_v17, %v629_v18 }
 0xb91   :  { %2520 = vmatpush3.msra.mxu0 %v1594_v19 }
 0xb92   :  { %2522 = vmatmul.mubr.msk.f32.vlgmr.msra.gmra.mrb[20].mxu0 %vm620_vm10, %v3023_v59  ;;  %2529 = vmatprep.subr.mxu0 %v2750_v12 }
 0xb93   :  { %2531 = vmatprep.mubr.msk.f32.mxu0 %vm2756_vm14, %v2750_v12 }
 0xc65   :  { %v1664_v20 = vpop.f32.mrb[20].mxu0 }
 0xc66   :  { %v1668_v43 = vmul.f32 %v1664_v20, %v629_v18  ;;  %v2523_v40 = vpop.f32.mrb[21].mxu0 }
 0xc68   :  { %v1669_v21 = vmul.f32 %v1668_v43, %v629_v18  ;;  %1814 = vrot.lane.b32.xlu0 %v1668_v43, %s2764_s12 }
 0xc6a   :  { %2525 = vmatpush3.msra.mxu1 %v1669_v21 }
 0xc6b   :  { %2527 = vmatmul.mubr.msk.f32.vlgmr.msra.gmra.mrb[22].mxu1 %vm620_vm10, %v3023_v59  ;;  %2652 = vmatprep.subr.bf16.mxu1 %v2755_v47 }
 0xc6c   :  { %2550 = vmatprep.mubr.msk.f32.mxu1 %vm2756_vm14, %v2750_v12  ;;  %2654 = vmatpush3.bf16.msra.mxu1 %v2653_v27 }
 0xc6d   :  { %2655 = vmatprep.subr.bf16.mxu1 %v2755_v47 }
 0xcda   :  { %v1815_v44 = vpop.permute.xlu0 %1814 }
 0xcdb   :  { %v1825_v46 = vsel %vm227_vm13, %v1593_v17, %v1815_v44 }
 0xd3e   :  { %v1736_v22 = vpop.f32.mrb[22].mxu1 }
 0xd3f   :  { %v1740_v0 = vmul.f32 %v1736_v22, %v629_v18  ;;  %v2528_v23 = vpop.f32.mrb[23].mxu1 }
 0xd41   :  { %v1741_v24 = vmul.f32 %v1740_v0, %v629_v18  ;;  %1818 = vrot.lane.b32.xlu0 %v1740_v0, %s2765_s21 }
 0xd43   :  { %2530 = vmatpush3.msra.mxu0 %v1741_v24 }
 0xd44   :  { %2532 = vmatmul.mubr.msk.f32.vlgmr.msra.gmra.mrb[22].mxu0 %vm620_vm10, %v3023_v59  ;;  %2553 = vmatprep.subr.mxu0 %v2750_v12  ;;  %v1832_v59 = vld [vmem:[%s3287_s5 + $0xb8] sm:$0xff] }
 0xd45   :  { %2555 = vmatprep.mubr.msk.f32.mxu0 %vm2756_vm14, %v2750_v12  ;;  %v2656_v29 = vpack.c.bf16 %v1832_v59, %v1831_v42 }
 0xd47   :  { %2657 = vmatpush3.bf16.msra.mxu1 %v2656_v29 }
 0xd48   :  { %2658 = vmatprep.subr.bf16.mxu1 %v2755_v47 }
 0xd4b   :  { %2660 = vmatpush3.bf16.msra.mxu1 %v2659_v34 }
 0xd4c   :  { %2661 = vmatprep.subr.bf16.mxu1 %v2755_v47 }
 0xd4f   :  { %2663 = vmatpush3.bf16.msra.mxu1 %v2662_v37 }
 0xdb3   :  { %v1819_v45 = vpop.permute.xlu0 %1818 }
 0xdb4   :  { %v1826_v48 = vsel %vm1343_vm9, %v1825_v46, %v1819_v45 }
 0xe17   :  { %v1808_v5 = vpop.f32.mrb[22].mxu0 }
 0xe18   :  { %v1812_v39 = vmul.f32 %v1808_v5, %v629_v18  ;;  %v2533_v9 = vpop.f32.mrb[23].mxu0 }
 0xe1a   :  { %1822 = vrot.lane.b32.xlu0 %v1812_v39, %s2766_s13 }
 0xe8c   :  { %v1823_v49 = vpop.permute.xlu0 %1822 }
 0xe8d   :  { %v1828_v50 = vsel %vm1827_vm12, %v1826_v48, %v1823_v49 }
 0xe8e   :  { %2551 = vmatmul.mubr.msk.f32.vlgmr.msra.gmra.mrb[24].mxu1 %vm1842_vm4, %v1828_v50 }
 0xf61   :  { %v1912_v52 = vpop.f32.mrb[24].mxu1 }
 0xf62   :  { %v1913_v7 = vadd.f32 %v2241_v51, %v1912_v52  ;;  %v2552_v31 = vpop.f32.mrb[25].mxu1 }
 0xf64   :  { %v1916_v55 = vmax.f32 %v1913_v7, 0.0 }
 0xf66   :  { %1991 = vrot.lane.b32.xlu0 %v1916_v55, %s2764_s12  ;;  %2554 = vmatpush3.msra.mxu0 %v1916_v55 }
 0xf67   :  { %2556 = vmatmul.mubr.msk.f32.vlgmr.msra.gmra.mrb[24].mxu0 %vm620_vm10, %v3156_v58  ;;  %2664 = vmatprep.subr.bf16.mxu0 %v2755_v47  ;;  %v2078_v58 = vld [vmem:[%s3287_s5 + $0x100] sm:$0xff] }
 0xf68   :  { %2666 = vmatpush3.bf16.msra.mxu0 %v2665_v28  ;;  %2566 = vmatprep.mubr.msk.f32.mxu0 %vm2756_vm14, %v2750_v12  ;;  %v2671_v6 = vpack.c.bf16 %v2079_v3, %v2078_v58 }
 0xf69   :  { %2667 = vmatprep.subr.bf16.mxu0 %v2755_v47 }
 0xf6c   :  { %2669 = vmatpush3.bf16.msra.mxu0 %v2668_v57 }
 0xf6d   :  { %2670 = vmatprep.subr.bf16.mxu0 %v2755_v47  ;;  %v2244_v47 = vld [vmem:[%s3287_s5 + $0x116] ss:$0 sm:$0xff] }
 0xfd8   :  { %v1992_v38 = vpop.permute.xlu0 %1991 }
0x103a   :  { %v1986_v60 = vpop.f32.mrb[24].mxu0 }
0x103b   :  { %v1994_v41 = vsel %vm227_vm13, %v1986_v60, %v1992_v38  ;;  %v2557_v61 = vpop.f32.mrb[25].mxu0 }
0x103c   :  { %2567 = vmatmul.mubr.msk.f32.vlgmr.msra.gmra.mrb[26].mxu0 %vm1343_vm9, %v1994_v41 }
0x103d   :  { %2573 = vmatprep.mubr.msk.f32.mxu0 %vm2756_vm14, %v2750_v12  ;;  %2672 = vmatpush3.bf16.msra.mxu0 %v2671_v6  ;;  %v2246_v12 = vld [vmem:[%s3287_s5 + $0x117] ss:$0 sm:$0xff] }
0x110f   :  { %v2073_v62 = vpop.f32.mrb[26].mxu0 }
0x1110   :  { %v2074_v63 = vadd.f32 %v2244_v47, %v2073_v62  ;;  %v2568_v1 = vpop.f32.mrb[27].mxu0 }
0x1112   :  { %v2077_v2 = vmax.f32 %v2074_v63, 0.0 }
0x1114   :  { %2574 = vmatmul.mubr.msk.f32.vlgmr.msra.gmra.mrb[28].mxu0 %vm227_vm13, %v2077_v2 }
0x11e7   :  { %v2154_v4 = vpop.f32.mrb[28].mxu0 }
0x11e8   :  { %v2155_v8 = vadd.f32 %v2246_v12, %v2154_v4  ;;  %v2575_v10 = vpop.f32.mrb[29].mxu0 }
0x11ea   :  { %2158 = vst.msk [vmem:[#allocation2] sm:$0xff] %vm620_vm10, %v2155_v8 }
0x11eb   :  { %2736 = shalt.err (!%p2733_p4)
}
0x11ec   :  { %s2737_s9 = scalar_lea.hbm %s3288_s6, 128 }
0x11ed   :  { %p2738_p5 = scmp.ne.s32.totalorder %s3288_s6, %s2737_s9  ;;  %p2741_p6 = scmp.lt.u32.totalorder %s2737_s9, %s3288_s6 }
0x11ef   :  { %p2743_p7 = pnand %p2741_p6, %p2738_p5 }
0x11f1   :  { %2746 = shalt.err (!%p2743_p7)
}
0x11f2   :  { %2168 = dma.vmem_to_hbm [thread:$0]  %s2166_s29, 128, %s3288_s6, [#allocation3]  }
0x11f3   :  { %2747 = dma.done.wait [#allocation3], 128  }
0x11f4   :  { %2748 = vsyncadd [#allocation3], 4294967168 }
0x11f5   :  { %2172 = vsyncpa [#allocation3], 1 }

</bundles_post_ra>
